<compile_context>
chip_gen: v6e
topology: v6e:2x2x1
jax: 0.10.0
libtpu: 0.0.40
codegen_flags: <defaults>
</compile_context>

<pallas_src>
import functools

import jax
import jax.numpy as jnp
from jax import lax
from jax.experimental import pallas as pl
from jax.experimental.pallas import tpu as pltpu


# ---------------------------------------------------------------------------
# Small helpers
# ---------------------------------------------------------------------------

def _round_up(x: int, m: int) -> int:
    return (x + m - 1) // m * m


def _tpu_generation_info():
    """Returns (name, vmem_request_bytes, target_batch_tile)."""
    kind = ""
    try:
        kind = jax.devices()[0].device_kind.lower()
    except Exception:
        pass
    if "v7" in kind:            # 64 MiB physical VMEM per TensorCore -> headroom
        return "v7x", 48 << 20, 512
    if "v6" in kind:            # 128 MiB physical VMEM
        return "v6e", 100 << 20, 512
    if "v5" in kind:            # 128 MiB physical VMEM
        return "v5e", 96 << 20, 256
    if "v4" in kind:
        return "v4", 96 << 20, 256
    if "v3" in kind or "v2" in kind:
        return "v3", 12 << 20, 128
    return "unknown", 48 << 20, 256


# ---------------------------------------------------------------------------
# Kernels
# ---------------------------------------------------------------------------

def _resident_kernel(*refs, project_input: bool, num_layers: int):
    """grid = (batch tiles,); all weights resident in VMEM, layer loop inside."""
    if project_input:
        (x_ref, wp_ref, bp_ref, w1_ref, w2_ref, vec_ref,
         wc_ref, bc_ref, out_ref) = refs
    else:
        (x_ref, w1_ref, w2_ref, vec_ref, wc_ref, bc_ref, out_ref) = refs
        wp_ref = bp_ref = None

    if project_input:
        x = (jnp.dot(x_ref[...], wp_ref[...],
                     preferred_element_type=jnp.float32) + bp_ref[...])
    else:
        x = x_ref[...].astype(jnp.float32)

    def residual_block(l, x):
        w1 = w1_ref[l]                               # (H, H) bf16
        w2 = w2_ref[l]                               # (H, H) bf16
        vec = vec_ref[l]                             # (4, H) f32
        b1, b2 = vec[0:1], vec[1:2]
        ln_w, ln_b = vec[2:3], vec[3:4]

        h = jnp.dot(x.astype(w1.dtype), w1,
                    preferred_element_type=jnp.float32) + b1
        h = jnp.maximum(h, 0.0)                      # ReLU (dropout=identity, eval)
        h = jnp.dot(h.astype(w2.dtype), w2,
                    preferred_element_type=jnp.float32) + b2
        y = h + x                                    # residual add

        # LayerNorm over last dim, eps = 1e-5 (PyTorch default), f32 math.
        mean = jnp.mean(y, axis=-1, keepdims=True)
        var = jnp.mean(jnp.square(y - mean), axis=-1, keepdims=True)
        y = (y - mean) * lax.rsqrt(var + 1e-5)
        y = y * ln_w + ln_b
        return jnp.maximum(y, 0.0)                   # ReLU

    x = lax.fori_loop(0, num_layers, residual_block, x,
                      unroll=num_layers <= 8)

    out_ref[...] = (jnp.dot(x.astype(wc_ref.dtype), wc_ref[...],
                            preferred_element_type=jnp.float32) + bc_ref[...])


def _streaming_kernel(*refs, project_input: bool):
    """grid = (batch tiles, layers); per-layer weights streamed through VMEM."""
    if project_input:
        (x_ref, wp_ref, bp_ref, w1_ref, w2_ref, vec_ref,
         wc_ref, bc_ref, out_ref, x_scr) = refs
    else:
        (x_ref, w1_ref, w2_ref, vec_ref, wc_ref, bc_ref, out_ref, x_scr) = refs
        wp_ref = bp_ref = None

    l = pl.program_id(1)
    num_l = pl.num_programs(1)

    @pl.when(l == 0)
    def _():
        if project_input:
            x_scr[...] = (jnp.dot(x_ref[...], wp_ref[...],
                                  preferred_element_type=jnp.float32) + bp_ref[...])
        else:
            x_scr[...] = x_ref[...].astype(jnp.float32)

    x = x_scr[...]                                   # (TB, H) f32 carried activation
    w1 = w1_ref[0]                                   # (H, H) bf16
    w2 = w2_ref[0]                                   # (H, H) bf16
    vec = vec_ref[0]                                 # (4, H) f32
    b1, b2 = vec[0:1], vec[1:2]
    ln_w, ln_b = vec[2:3], vec[3:4]

    h = jnp.dot(x.astype(w1.dtype), w1, preferred_element_type=jnp.float32) + b1
    h = jnp.maximum(h, 0.0)                          # ReLU (dropout=identity, eval)
    h = jnp.dot(h.astype(w2.dtype), w2, preferred_element_type=jnp.float32) + b2
    x = h + x                                        # residual add

    mean = jnp.mean(x, axis=-1, keepdims=True)
    var = jnp.mean(jnp.square(x - mean), axis=-1, keepdims=True)
    x = (x - mean) * lax.rsqrt(var + 1e-5)
    x = x * ln_w + ln_b
    x = jnp.maximum(x, 0.0)                          # ReLU
    x_scr[...] = x                                   # carry to next layer step

    @pl.when(l == num_l - 1)
    def _():
        out_ref[...] = (jnp.dot(x.astype(wc_ref.dtype), wc_ref[...],
                                preferred_element_type=jnp.float32) + bc_ref[...])


# ---------------------------------------------------------------------------
# Wrapper
# ---------------------------------------------------------------------------

def residual_classifier_forward(features, params, *, num_layers, project_input,
                                batch_tile=None, force_streaming=False):
    B, D_in = features.shape
    H = params["w1"].shape[-1]
    C = params["wc"].shape[1]
    L = num_layers
    f32, bf16 = jnp.float32, jnp.bfloat16

    gen, vmem_budget, tb_target = _tpu_generation_info()
    if batch_tile is not None:
        tb_target = int(batch_tile)

    Cp = _round_up(C, 128)                           # lane-dense classifier output

    # --- parameter layout plumbing ---------------------------------------
    w1 = params["w1"].astype(bf16)                                        # [L,H,H]
    w2 = params["w2"].astype(bf16)                                        # [L,H,H]
    vecs = jnp.stack([params["b1"], params["b2"],
                      params["lnw"], params["lnb"]], axis=1).astype(f32)  # [L,4,H]
    wc = jnp.pad(params["wc"], ((0, 0), (0, Cp - C))).astype(bf16)        # [H,Cp]
    bc = jnp.pad(params["bc"], ((0, 0), (0, Cp - C))).astype(f32)         # [1,Cp]
    if project_input:
        wp = params["wp"].astype(bf16)                                    # [Din,H]
        bp = params["bp"].astype(f32)                                     # [1,H]

    in_dtype = bf16 if project_input else f32        # bf16 features when projecting
    x = features.astype(in_dtype)
    in_bytes = jnp.dtype(in_dtype).itemsize

    # --- schedule + tile selection (generation-aware VMEM budgeting) ------
    layer_w_bytes = 2 * L * H * H * 2 + L * 4 * H * 4
    head_w_bytes = H * Cp * 2 + Cp * 4
    proj_w_bytes = (D_in * H * 2 + H * 4) if project_input else 0
    all_w_bytes = layer_w_bytes + head_w_bytes + proj_w_bytes

    # Budget the resident schedule assuming the worst case (double-buffered
    # weights, i.e. pl.Buffered(1) not honoured by this Pallas version).
    use_resident = (not force_streaming) and (2 * all_w_bytes <= 0.6 * vmem_budget)
    if use_resident:
        per_row = (2 * D_in * in_bytes               # input tile (double-buffered)
                   + 2 * Cp * 4                      # output tile (double-buffered)
                   + 8 * H * 4)                      # live f32 activation headroom
        tb_cap = int((vmem_budget - 2 * all_w_bytes) // per_row)
        if tb_cap < min(64, B):
            use_resident = False

    if not use_resident:
        n_wbuf = 3 if gen in ("v5e", "v6e") else 2   # deeper weight prefetch (128MiB)
        stream_fixed = (2 * (head_w_bytes + proj_w_bytes)
                        + n_wbuf * (2 * H * H * 2) + 2 * (4 * H * 4))
        if n_wbuf == 3 and stream_fixed > 0.7 * vmem_budget:
            n_wbuf = 2
            stream_fixed = (2 * (head_w_bytes + proj_w_bytes)
                            + n_wbuf * (2 * H * H * 2) + 2 * (4 * H * 4))
        per_row = (2 * D_in * in_bytes + 2 * Cp * 4
                   + H * 4                           # activation carry scratch
                   + 6 * H * 4)                      # live f32 headroom
        tb_cap = max(int((vmem_budget - stream_fixed) // per_row), 8)

    TB = max(8, min(tb_target, tb_cap))
    TB -= TB % 8
    TB = min(TB, _round_up(B, 8))
    align = 256 if gen in ("v6e", "v7x") else 128    # fill the MXU M dimension
    if TB >= align:
        TB -= TB % align
    TB = max(TB, 8)
    B_pad = _round_up(B, TB)
    n_tiles = B_pad // TB

    if B_pad != B:
        x = jnp.pad(x, ((0, B_pad - B), (0, 0)))

    # --- cost estimate reflecting the actual schedule ----------------------
    weight_reads = 1 if use_resident else n_tiles
    bytes_accessed = (layer_w_bytes * weight_reads + head_w_bytes + proj_w_bytes
                      + B_pad * D_in * in_bytes + B_pad * Cp * 4)
    flops = 2 * B_pad * (L * 2 * H * H + H * Cp
                         + (D_in * H if project_input else 0))
    cost = pl.CostEstimate(flops=int(flops), transcendentals=int(B_pad * L),
                           bytes_accessed=int(bytes_accessed))

    compiler_params = pltpu.CompilerParams(
        dimension_semantics=("parallel",) if use_resident
        else ("parallel", "arbitrary"),
        vmem_limit_bytes=int(vmem_budget))
    out_shape = jax.ShapeDtypeStruct((B_pad, Cp), f32)

    def _call(enable_pipeline_mode):
        def spec(shape, imap, n_buf=None):
            if n_buf is None or not enable_pipeline_mode:
                return pl.BlockSpec(shape, imap)
            return pl.BlockSpec(shape, imap, pipeline_mode=pl.Buffered(n_buf))

        if use_resident:
            inputs = [x]
            in_specs = [pl.BlockSpec((TB, D_in), lambda i: (i, 0))]
            if project_input:
                inputs += [wp, bp]
                in_specs += [spec((D_in, H), lambda i: (0, 0), 1),
                             spec((1, H), lambda i: (0, 0), 1)]
            inputs += [w1, w2, vecs, wc, bc]
            in_specs += [spec((L, H, H), lambda i: (0, 0, 0), 1),   # w1 (resident)
                         spec((L, H, H), lambda i: (0, 0, 0), 1),   # w2 (resident)
                         spec((L, 4, H), lambda i: (0, 0, 0), 1),   # packed biases/LN
                         spec((H, Cp), lambda i: (0, 0), 1),        # wc (resident)
                         spec((1, Cp), lambda i: (0, 0), 1)]        # bc (resident)
            kernel = functools.partial(_resident_kernel,
                                       project_input=project_input, num_layers=L)
            return pl.pallas_call(
                kernel, out_shape=out_shape, grid=(n_tiles,),
                in_specs=in_specs,
                out_specs=pl.BlockSpec((TB, Cp), lambda i: (i, 0)),
                compiler_params=compiler_params, cost_estimate=cost,
            )(*inputs)

        # ---- streaming schedule -------------------------------------------
        inputs = [x]
        in_specs = [pl.BlockSpec((TB, D_in), lambda i, l: (i, 0))]
        if project_input:
            inputs += [wp, bp]
            in_specs += [spec((D_in, H), lambda i, l: (0, 0), 1),
                         spec((1, H), lambda i, l: (0, 0), 1)]
        inputs += [w1, w2, vecs, wc, bc]
        in_specs += [spec((1, H, H), lambda i, l: (l, 0, 0), n_wbuf),  # w1[l]
                     spec((1, H, H), lambda i, l: (l, 0, 0), n_wbuf),  # w2[l]
                     pl.BlockSpec((1, 4, H), lambda i, l: (l, 0, 0)),  # vec[l]
                     spec((H, Cp), lambda i, l: (0, 0), 1),            # wc
                     spec((1, Cp), lambda i, l: (0, 0), 1)]            # bc
        kernel = functools.partial(_streaming_kernel, project_input=project_input)
        return pl.pallas_call(
            kernel, out_shape=out_shape, grid=(n_tiles, L),
            in_specs=in_specs,
            out_specs=pl.BlockSpec((TB, Cp), lambda i, l: (i, 0)),
            scratch_shapes=[pltpu.VMEM((TB, H), f32)],                 # activation carry
            compiler_params=compiler_params, cost_estimate=cost,
        )(*inputs)

    try:
        out = _call(True)
    except Exception:
        # pipeline_mode / pl.Buffered not supported by this Pallas version:
        # rebuild with default double buffering (correctness unaffected).
        out = _call(False)

    return out[:B, :C]


# ---------------------------------------------------------------------------
# Deterministic parameter construction (mirrors the PyTorch module __init__).
# ---------------------------------------------------------------------------

def _xavier_uniform(key, fan_in, fan_out):
    # nn.init.xavier_uniform_ on a [out, in] weight; stored transposed as
    # [in, out] so the kernel computes x @ W.
    bound = (6.0 / (fan_in + fan_out)) ** 0.5
    return jax.random.uniform(key, (fan_in, fan_out), dtype=jnp.float32,
                              minval=-bound, maxval=bound)


def make_params(key, input_dim, hidden_dim, num_classes, num_layers):
    keys = jax.random.split(key, 2 + 2 * num_layers)
    H = hidden_dim
    project_input = input_dim != hidden_dim

    params = {}
    if project_input:
        params["wp"] = _xavier_uniform(keys[0], input_dim, H)
        params["bp"] = jnp.zeros((1, H), dtype=jnp.float32)

    params["w1"] = jnp.stack(
        [_xavier_uniform(keys[2 + 2 * l], H, H) for l in range(num_layers)])
    params["w2"] = jnp.stack(
        [_xavier_uniform(keys[3 + 2 * l], H, H) for l in range(num_layers)])
    params["b1"] = jnp.zeros((num_layers, H), dtype=jnp.float32)
    params["b2"] = jnp.zeros((num_layers, H), dtype=jnp.float32)
    params["lnw"] = jnp.ones((num_layers, H), dtype=jnp.float32)
    params["lnb"] = jnp.zeros((num_layers, H), dtype=jnp.float32)

    params["wc"] = _xavier_uniform(keys[1], H, num_classes)
    params["bc"] = jnp.zeros((1, num_classes), dtype=jnp.float32)
    return params, project_input


# ---------------------------------------------------------------------------
# Pure-JAX reference (same precision policy as the kernel: bf16 matmul
# operands, f32 accumulation, f32 LayerNorm).
# ---------------------------------------------------------------------------

def reference_forward(features, params, *, num_layers, project_input):
    f32, bf16 = jnp.float32, jnp.bfloat16
    x = features.astype(f32)
    if project_input:
        x = jnp.dot(x.astype(bf16), params["wp"].astype(bf16),
                    preferred_element_type=f32) + params["bp"]
    for l in range(num_layers):
        res = x
        h = jnp.dot(x.astype(bf16), params["w1"][l].astype(bf16),
                    preferred_element_type=f32) + params["b1"][l]
        h = jnp.maximum(h, 0.0)
        h = jnp.dot(h.astype(bf16), params["w2"][l].astype(bf16),
                    preferred_element_type=f32) + params["b2"][l]
        x = h + res
        mean = jnp.mean(x, axis=-1, keepdims=True)
        var = jnp.mean(jnp.square(x - mean), axis=-1, keepdims=True)
        x = (x - mean) * lax.rsqrt(var + 1e-5)
        x = x * params["lnw"][l] + params["lnb"][l]
        x = jnp.maximum(x, 0.0)
    return jnp.dot(x.astype(bf16), params["wc"].astype(bf16),
                   preferred_element_type=f32) + params["bc"]


if __name__ == "__main__":
    key = jax.random.PRNGKey(0)
    k_feat, k_params, k_feat2, k_params2 = jax.random.split(key, 4)

    # Case 1: input_dim != hidden_dim -> input projection, resident schedule.
    B, D_IN, H, C, L = 8, 16, 32, 8, 2
    features = jax.random.normal(k_feat, (B, D_IN), dtype=jnp.float32)
    params, project_input = make_params(k_params, D_IN, H, C, L)

    logits = residual_classifier_forward(features, params, num_layers=L,
                                         project_input=project_input)
    logits = jax.block_until_ready(logits)
    ref = reference_forward(features, params, num_layers=L,
                            project_input=project_input)
    assert logits.shape == (B, C)
    assert jnp.allclose(logits, ref, atol=5e-3, rtol=5e-3), "mismatch (proj, resident)"

    # Case 2: input_dim == hidden_dim -> nn.Identity projection (wp dropped).
    B2, D2, C2, L2 = 8, 32, 8, 2
    features2 = jax.random.normal(k_feat2, (B2, D2), dtype=jnp.float32)
    params2, project_input2 = make_params(k_params2, D2, D2, C2, L2)
    assert not project_input2
    logits2 = residual_classifier_forward(features2, params2, num_layers=L2,
                                          project_input=project_input2)
    logits2 = jax.block_until_ready(logits2)
    ref2 = reference_forward(features2, params2, num_layers=L2,
                             project_input=project_input2)
    assert logits2.shape == (B2, C2)
    assert jnp.allclose(logits2, ref2, atol=5e-3, rtol=5e-3), "mismatch (identity, resident)"

    # Case 3: force the streaming (batch-tile x layer grid) schedule with two
    # batch tiles, exercising that code path as well.
    B3 = 16
    features3 = jax.random.normal(k_feat, (B3, D_IN), dtype=jnp.float32)
    logits3 = residual_classifier_forward(features3, params, num_layers=L,
                                          project_input=project_input,
                                          batch_tile=8, force_streaming=True)
    logits3 = jax.block_until_ready(logits3)
    ref3 = reference_forward(features3, params, num_layers=L,
                             project_input=project_input)
    assert logits3.shape == (B3, C)
    assert jnp.allclose(logits3, ref3, atol=5e-3, rtol=5e-3), "mismatch (streaming)"

    print("KERNEL_OK")
</pallas_src>

<mosaic_0001>
module attributes {stable_mosaic.version = 11 : i64} {
  func.func @_resident_kernel(%arg0: i32, %arg1: memref<8x16xbf16, #tpu.memory_space<vmem>>, %arg2: memref<16x32xbf16, #tpu.memory_space<vmem>>, %arg3: memref<1x32xf32, #tpu.memory_space<vmem>>, %arg4: memref<2x32x32xbf16, #tpu.memory_space<vmem>>, %arg5: memref<2x32x32xbf16, #tpu.memory_space<vmem>>, %arg6: memref<2x4x32xf32, #tpu.memory_space<vmem>>, %arg7: memref<32x128xbf16, #tpu.memory_space<vmem>>, %arg8: memref<1x128xf32, #tpu.memory_space<vmem>>, %arg9: memref<8x128xf32, #tpu.memory_space<vmem>>) attributes {dimension_semantics = [#tpu.dimension_semantics<parallel>], iteration_bounds = array<i64: 1>, scalar_prefetch = 0 : i64, scratch_operands = 0 : i64, tpu.core_type = #tpu.core_type<tc>, window_params = [{transform_indices = @transform_0, window_bounds = array<i64: 8, 16>}, {pipeline_mode = #tpu.pipeline_mode<synchronous>, transform_indices = @transform_1, window_bounds = array<i64: 16, 32>}, {pipeline_mode = #tpu.pipeline_mode<synchronous>, transform_indices = @transform_2, window_bounds = array<i64: 1, 32>}, {pipeline_mode = #tpu.pipeline_mode<synchronous>, transform_indices = @transform_3, window_bounds = array<i64: 2, 32, 32>}, {pipeline_mode = #tpu.pipeline_mode<synchronous>, transform_indices = @transform_4, window_bounds = array<i64: 2, 32, 32>}, {pipeline_mode = #tpu.pipeline_mode<synchronous>, transform_indices = @transform_5, window_bounds = array<i64: 2, 4, 32>}, {pipeline_mode = #tpu.pipeline_mode<synchronous>, transform_indices = @transform_6, window_bounds = array<i64: 32, 128>}, {pipeline_mode = #tpu.pipeline_mode<synchronous>, transform_indices = @transform_7, window_bounds = array<i64: 1, 128>}, {transform_indices = @transform_8, window_bounds = array<i64: 8, 128>}]} {
    %c0 = arith.constant 0 : index
    %c0_0 = arith.constant 0 : index
    %0 = vector.load %arg1[%c0, %c0_0] : memref<8x16xbf16, #tpu.memory_space<vmem>>, vector<8x16xbf16>
    %c0_1 = arith.constant 0 : index
    %c0_2 = arith.constant 0 : index
    %1 = vector.load %arg2[%c0_1, %c0_2] : memref<16x32xbf16, #tpu.memory_space<vmem>>, vector<16x32xbf16>
    %cst = arith.constant dense<0.000000e+00> : vector<8x32xf32>
    %2 = tpu.matmul %0, %1, %cst {dimension_numbers = #tpu.dot_dimension_numbers<[1], [0], [0], [1], [0, 0, 1, 1], [], []>} : vector<8x16xbf16>, vector<16x32xbf16>, vector<8x32xf32> -> vector<8x32xf32>
    %c0_3 = arith.constant 0 : index
    %c0_4 = arith.constant 0 : index
    %3 = vector.load %arg3[%c0_3, %c0_4] : memref<1x32xf32, #tpu.memory_space<vmem>>, vector<1x32xf32>
    %4 = vector.broadcast %3 : vector<1x32xf32> to vector<8x32xf32>
    %5 = arith.addf %2, %4 : vector<8x32xf32>
    %c0_i32 = arith.constant 0 : i32
    %6 = arith.index_cast %c0_i32 : i32 to index
    %c0_5 = arith.constant 0 : index
    %c0_6 = arith.constant 0 : index
    %7 = vector.load %arg4[%6, %c0_5, %c0_6] : memref<2x32x32xbf16, #tpu.memory_space<vmem>>, vector<1x32x32xbf16>
    %8 = vector.shape_cast %7 : vector<1x32x32xbf16> to vector<32x32xbf16>
    %9 = arith.index_cast %c0_i32 : i32 to index
    %c0_7 = arith.constant 0 : index
    %c0_8 = arith.constant 0 : index
    %10 = vector.load %arg5[%9, %c0_7, %c0_8] : memref<2x32x32xbf16, #tpu.memory_space<vmem>>, vector<1x32x32xbf16>
    %11 = vector.shape_cast %10 : vector<1x32x32xbf16> to vector<32x32xbf16>
    %12 = arith.index_cast %c0_i32 : i32 to index
    %c0_9 = arith.constant 0 : index
    %c0_10 = arith.constant 0 : index
    %13 = vector.load %arg6[%12, %c0_9, %c0_10] : memref<2x4x32xf32, #tpu.memory_space<vmem>>, vector<1x4x32xf32>
    %14 = vector.shape_cast %13 : vector<1x4x32xf32> to vector<4x32xf32>
    %15 = vector.extract_strided_slice %14 {offsets = [0, 0], sizes = [1, 32], strides = [1, 1]} : vector<4x32xf32> to vector<1x32xf32>
    %16 = vector.extract_strided_slice %14 {offsets = [1, 0], sizes = [1, 32], strides = [1, 1]} : vector<4x32xf32> to vector<1x32xf32>
    %17 = vector.extract_strided_slice %14 {offsets = [2, 0], sizes = [1, 32], strides = [1, 1]} : vector<4x32xf32> to vector<1x32xf32>
    %18 = vector.extract_strided_slice %14 {offsets = [3, 0], sizes = [1, 32], strides = [1, 1]} : vector<4x32xf32> to vector<1x32xf32>
    %19 = arith.truncf %5 : vector<8x32xf32> to vector<8x32xbf16>
    %cst_11 = arith.constant dense<0.000000e+00> : vector<8x32xf32>
    %20 = tpu.matmul %19, %8, %cst_11 {dimension_numbers = #tpu.dot_dimension_numbers<[1], [0], [0], [1], [0, 0, 1, 1], [], []>} : vector<8x32xbf16>, vector<32x32xbf16>, vector<8x32xf32> -> vector<8x32xf32>
    %21 = vector.broadcast %15 : vector<1x32xf32> to vector<8x32xf32>
    %22 = arith.addf %20, %21 : vector<8x32xf32>
    %cst_12 = arith.constant 0.000000e+00 : f32
    %23 = vector.broadcast %cst_12 : f32 to vector<8x32xf32>
    %24 = arith.maximumf %22, %23 : vector<8x32xf32>
    %25 = arith.truncf %24 : vector<8x32xf32> to vector<8x32xbf16>
    %cst_13 = arith.constant dense<0.000000e+00> : vector<8x32xf32>
    %26 = tpu.matmul %25, %11, %cst_13 {dimension_numbers = #tpu.dot_dimension_numbers<[1], [0], [0], [1], [0, 0, 1, 1], [], []>} : vector<8x32xbf16>, vector<32x32xbf16>, vector<8x32xf32> -> vector<8x32xf32>
    %27 = vector.broadcast %16 : vector<1x32xf32> to vector<8x32xf32>
    %28 = arith.addf %26, %27 : vector<8x32xf32>
    %29 = arith.addf %28, %5 : vector<8x32xf32>
    %cst_14 = arith.constant dense<0.000000e+00> : vector<8xf32>
    %30 = vector.multi_reduction <add>, %29, %cst_14 [1] : vector<8x32xf32> to vector<8xf32>
    %31 = vector.shape_cast %30 : vector<8xf32> to vector<8x1xf32>
    %cst_15 = arith.constant 3.200000e+01 : f32
    %32 = vector.broadcast %cst_15 : f32 to vector<8x1xf32>
    %33 = arith.divf %31, %32 : vector<8x1xf32>
    %34 = vector.broadcast %33 : vector<8x1xf32> to vector<8x32xf32>
    %35 = arith.subf %29, %34 : vector<8x32xf32>
    %36 = arith.mulf %35, %35 : vector<8x32xf32>
    %cst_16 = arith.constant dense<0.000000e+00> : vector<8xf32>
    %37 = vector.multi_reduction <add>, %36, %cst_16 [1] : vector<8x32xf32> to vector<8xf32>
    %38 = vector.shape_cast %37 : vector<8xf32> to vector<8x1xf32>
    %cst_17 = arith.constant 3.200000e+01 : f32
    %39 = vector.broadcast %cst_17 : f32 to vector<8x1xf32>
    %40 = arith.divf %38, %39 : vector<8x1xf32>
    %41 = vector.broadcast %33 : vector<8x1xf32> to vector<8x32xf32>
    %42 = arith.subf %29, %41 : vector<8x32xf32>
    %cst_18 = arith.constant 9.99999974E-6 : f32
    %43 = vector.broadcast %cst_18 : f32 to vector<8x1xf32>
    %44 = arith.addf %40, %43 : vector<8x1xf32>
    %45 = math.rsqrt %44 : vector<8x1xf32>
    %46 = vector.broadcast %45 : vector<8x1xf32> to vector<8x32xf32>
    %47 = arith.mulf %42, %46 : vector<8x32xf32>
    %48 = vector.broadcast %17 : vector<1x32xf32> to vector<8x32xf32>
    %49 = arith.mulf %47, %48 : vector<8x32xf32>
    %50 = vector.broadcast %18 : vector<1x32xf32> to vector<8x32xf32>
    %51 = arith.addf %49, %50 : vector<8x32xf32>
    %cst_19 = arith.constant 0.000000e+00 : f32
    %52 = vector.broadcast %cst_19 : f32 to vector<8x32xf32>
    %53 = arith.maximumf %51, %52 : vector<8x32xf32>
    %c1_i32 = arith.constant 1 : i32
    %54 = arith.index_cast %c1_i32 : i32 to index
    %c0_20 = arith.constant 0 : index
    %c0_21 = arith.constant 0 : index
    %55 = vector.load %arg4[%54, %c0_20, %c0_21] : memref<2x32x32xbf16, #tpu.memory_space<vmem>>, vector<1x32x32xbf16>
    %56 = vector.shape_cast %55 : vector<1x32x32xbf16> to vector<32x32xbf16>
    %57 = arith.index_cast %c1_i32 : i32 to index
    %c0_22 = arith.constant 0 : index
    %c0_23 = arith.constant 0 : index
    %58 = vector.load %arg5[%57, %c0_22, %c0_23] : memref<2x32x32xbf16, #tpu.memory_space<vmem>>, vector<1x32x32xbf16>
    %59 = vector.shape_cast %58 : vector<1x32x32xbf16> to vector<32x32xbf16>
    %60 = arith.index_cast %c1_i32 : i32 to index
    %c0_24 = arith.constant 0 : index
    %c0_25 = arith.constant 0 : index
    %61 = vector.load %arg6[%60, %c0_24, %c0_25] : memref<2x4x32xf32, #tpu.memory_space<vmem>>, vector<1x4x32xf32>
    %62 = vector.shape_cast %61 : vector<1x4x32xf32> to vector<4x32xf32>
    %63 = vector.extract_strided_slice %62 {offsets = [0, 0], sizes = [1, 32], strides = [1, 1]} : vector<4x32xf32> to vector<1x32xf32>
    %64 = vector.extract_strided_slice %62 {offsets = [1, 0], sizes = [1, 32], strides = [1, 1]} : vector<4x32xf32> to vector<1x32xf32>
    %65 = vector.extract_strided_slice %62 {offsets = [2, 0], sizes = [1, 32], strides = [1, 1]} : vector<4x32xf32> to vector<1x32xf32>
    %66 = vector.extract_strided_slice %62 {offsets = [3, 0], sizes = [1, 32], strides = [1, 1]} : vector<4x32xf32> to vector<1x32xf32>
    %67 = arith.truncf %53 : vector<8x32xf32> to vector<8x32xbf16>
    %cst_26 = arith.constant dense<0.000000e+00> : vector<8x32xf32>
    %68 = tpu.matmul %67, %56, %cst_26 {dimension_numbers = #tpu.dot_dimension_numbers<[1], [0], [0], [1], [0, 0, 1, 1], [], []>} : vector<8x32xbf16>, vector<32x32xbf16>, vector<8x32xf32> -> vector<8x32xf32>
    %69 = vector.broadcast %63 : vector<1x32xf32> to vector<8x32xf32>
    %70 = arith.addf %68, %69 : vector<8x32xf32>
    %cst_27 = arith.constant 0.000000e+00 : f32
    %71 = vector.broadcast %cst_27 : f32 to vector<8x32xf32>
    %72 = arith.maximumf %70, %71 : vector<8x32xf32>
    %73 = arith.truncf %72 : vector<8x32xf32> to vector<8x32xbf16>
    %cst_28 = arith.constant dense<0.000000e+00> : vector<8x32xf32>
    %74 = tpu.matmul %73, %59, %cst_28 {dimension_numbers = #tpu.dot_dimension_numbers<[1], [0], [0], [1], [0, 0, 1, 1], [], []>} : vector<8x32xbf16>, vector<32x32xbf16>, vector<8x32xf32> -> vector<8x32xf32>
    %75 = vector.broadcast %64 : vector<1x32xf32> to vector<8x32xf32>
    %76 = arith.addf %74, %75 : vector<8x32xf32>
    %77 = arith.addf %76, %53 : vector<8x32xf32>
    %cst_29 = arith.constant dense<0.000000e+00> : vector<8xf32>
    %78 = vector.multi_reduction <add>, %77, %cst_29 [1] : vector<8x32xf32> to vector<8xf32>
    %79 = vector.shape_cast %78 : vector<8xf32> to vector<8x1xf32>
    %cst_30 = arith.constant 3.200000e+01 : f32
    %80 = vector.broadcast %cst_30 : f32 to vector<8x1xf32>
    %81 = arith.divf %79, %80 : vector<8x1xf32>
    %82 = vector.broadcast %81 : vector<8x1xf32> to vector<8x32xf32>
    %83 = arith.subf %77, %82 : vector<8x32xf32>
    %84 = arith.mulf %83, %83 : vector<8x32xf32>
    %cst_31 = arith.constant dense<0.000000e+00> : vector<8xf32>
    %85 = vector.multi_reduction <add>, %84, %cst_31 [1] : vector<8x32xf32> to vector<8xf32>
    %86 = vector.shape_cast %85 : vector<8xf32> to vector<8x1xf32>
    %cst_32 = arith.constant 3.200000e+01 : f32
    %87 = vector.broadcast %cst_32 : f32 to vector<8x1xf32>
    %88 = arith.divf %86, %87 : vector<8x1xf32>
    %89 = vector.broadcast %81 : vector<8x1xf32> to vector<8x32xf32>
    %90 = arith.subf %77, %89 : vector<8x32xf32>
    %cst_33 = arith.constant 9.99999974E-6 : f32
    %91 = vector.broadcast %cst_33 : f32 to vector<8x1xf32>
    %92 = arith.addf %88, %91 : vector<8x1xf32>
    %93 = math.rsqrt %92 : vector<8x1xf32>
    %94 = vector.broadcast %93 : vector<8x1xf32> to vector<8x32xf32>
    %95 = arith.mulf %90, %94 : vector<8x32xf32>
    %96 = vector.broadcast %65 : vector<1x32xf32> to vector<8x32xf32>
    %97 = arith.mulf %95, %96 : vector<8x32xf32>
    %98 = vector.broadcast %66 : vector<1x32xf32> to vector<8x32xf32>
    %99 = arith.addf %97, %98 : vector<8x32xf32>
    %cst_34 = arith.constant 0.000000e+00 : f32
    %100 = vector.broadcast %cst_34 : f32 to vector<8x32xf32>
    %101 = arith.maximumf %99, %100 : vector<8x32xf32>
    %c2_i32 = arith.constant 2 : i32
    %102 = arith.truncf %101 : vector<8x32xf32> to vector<8x32xbf16>
    %c0_35 = arith.constant 0 : index
    %c0_36 = arith.constant 0 : index
    %103 = vector.load %arg7[%c0_35, %c0_36] : memref<32x128xbf16, #tpu.memory_space<vmem>>, vector<32x128xbf16>
    %cst_37 = arith.constant dense<0.000000e+00> : vector<8x128xf32>
    %104 = tpu.matmul %102, %103, %cst_37 {dimension_numbers = #tpu.dot_dimension_numbers<[1], [0], [0], [1], [0, 0, 1, 1], [], []>} : vector<8x32xbf16>, vector<32x128xbf16>, vector<8x128xf32> -> vector<8x128xf32>
    %c0_38 = arith.constant 0 : index
    %c0_39 = arith.constant 0 : index
    %105 = vector.load %arg8[%c0_38, %c0_39] : memref<1x128xf32, #tpu.memory_space<vmem>>, vector<1x128xf32>
    %106 = vector.broadcast %105 : vector<1x128xf32> to vector<8x128xf32>
    %107 = arith.addf %104, %106 : vector<8x128xf32>
    %c0_40 = arith.constant 0 : index
    %c0_41 = arith.constant 0 : index
    %108 = vector.load %arg9[%c0_40, %c0_41] : memref<8x128xf32, #tpu.memory_space<vmem>>, vector<8x128xf32>
    tpu.vector_store %arg9[%c0_40, %c0_41], %107 {strides = array<i32>} : memref<8x128xf32, #tpu.memory_space<vmem>>, vector<8x128xf32>,
    return
  }
  func.func @transform_0(%arg0: i32) -> (i32, i32) {
    %c0_i32 = arith.constant 0 : i32
    %c0_i32_0 = arith.constant 0 : i32
    return %arg0, %c0_i32 : i32, i32
  }
  func.func @transform_1(%arg0: i32) -> (i32, i32) {
    %c0_i32 = arith.constant 0 : i32
    %c0_i32_0 = arith.constant 0 : i32
    %c0_i32_1 = arith.constant 0 : i32
    return %c0_i32, %c0_i32_0 : i32, i32
  }
  func.func @transform_2(%arg0: i32) -> (i32, i32) {
    %c0_i32 = arith.constant 0 : i32
    %c0_i32_0 = arith.constant 0 : i32
    %c0_i32_1 = arith.constant 0 : i32
    return %c0_i32, %c0_i32_0 : i32, i32
  }
  func.func @transform_3(%arg0: i32) -> (i32, i32, i32) {
    %c0_i32 = arith.constant 0 : i32
    %c0_i32_0 = arith.constant 0 : i32
    %c0_i32_1 = arith.constant 0 : i32
    %c0_i32_2 = arith.constant 0 : i32
    return %c0_i32, %c0_i32_0, %c0_i32_1 : i32, i32, i32
  }
  func.func @transform_4(%arg0: i32) -> (i32, i32, i32) {
    %c0_i32 = arith.constant 0 : i32
    %c0_i32_0 = arith.constant 0 : i32
    %c0_i32_1 = arith.constant 0 : i32
    %c0_i32_2 = arith.constant 0 : i32
    return %c0_i32, %c0_i32_0, %c0_i32_1 : i32, i32, i32
  }
  func.func @transform_5(%arg0: i32) -> (i32, i32, i32) {
    %c0_i32 = arith.constant 0 : i32
    %c0_i32_0 = arith.constant 0 : i32
    %c0_i32_1 = arith.constant 0 : i32
    %c0_i32_2 = arith.constant 0 : i32
    return %c0_i32, %c0_i32_0, %c0_i32_1 : i32, i32, i32
  }
  func.func @transform_6(%arg0: i32) -> (i32, i32) {
    %c0_i32 = arith.constant 0 : i32
    %c0_i32_0 = arith.constant 0 : i32
    %c0_i32_1 = arith.constant 0 : i32
    return %c0_i32, %c0_i32_0 : i32, i32
  }
  func.func @transform_7(%arg0: i32) -> (i32, i32) {
    %c0_i32 = arith.constant 0 : i32
    %c0_i32_0 = arith.constant 0 : i32
    %c0_i32_1 = arith.constant 0 : i32
    return %c0_i32, %c0_i32_0 : i32, i32
  }
  func.func @transform_8(%arg0: i32) -> (i32, i32) {
    %c0_i32 = arith.constant 0 : i32
    %c0_i32_0 = arith.constant 0 : i32
    return %arg0, %c0_i32 : i32, i32
  }
}

module attributes {stable_mosaic.version = 11 : i64} {
  func.func @_resident_kernel(%arg0: i32, %arg1: memref<8x16xbf16, #tpu.memory_space<vmem>>, %arg2: memref<16x32xbf16, #tpu.memory_space<vmem>>, %arg3: memref<1x32xf32, #tpu.memory_space<vmem>>, %arg4: memref<2x32x32xbf16, #tpu.memory_space<vmem>>, %arg5: memref<2x32x32xbf16, #tpu.memory_space<vmem>>, %arg6: memref<2x4x32xf32, #tpu.memory_space<vmem>>, %arg7: memref<32x128xbf16, #tpu.memory_space<vmem>>, %arg8: memref<1x128xf32, #tpu.memory_space<vmem>>, %arg9: memref<8x128xf32, #tpu.memory_space<vmem>>) attributes {dimension_semantics = [#tpu.dimension_semantics<parallel>], iteration_bounds = array<i64: 1>, scalar_prefetch = 0 : i64, scratch_operands = 0 : i64, tpu.core_type = #tpu.core_type<tc>, window_params = [{transform_indices = @transform_0, window_bounds = array<i64: 8, 16>}, {pipeline_mode = #tpu.pipeline_mode<synchronous>, transform_indices = @transform_1, window_bounds = array<i64: 16, 32>}, {pipeline_mode = #tpu.pipeline_mode<synchronous>, transform_indices = @transform_2, window_bounds = array<i64: 1, 32>}, {pipeline_mode = #tpu.pipeline_mode<synchronous>, transform_indices = @transform_3, window_bounds = array<i64: 2, 32, 32>}, {pipeline_mode = #tpu.pipeline_mode<synchronous>, transform_indices = @transform_4, window_bounds = array<i64: 2, 32, 32>}, {pipeline_mode = #tpu.pipeline_mode<synchronous>, transform_indices = @transform_5, window_bounds = array<i64: 2, 4, 32>}, {pipeline_mode = #tpu.pipeline_mode<synchronous>, transform_indices = @transform_6, window_bounds = array<i64: 32, 128>}, {pipeline_mode = #tpu.pipeline_mode<synchronous>, transform_indices = @transform_7, window_bounds = array<i64: 1, 128>}, {transform_indices = @transform_8, window_bounds = array<i64: 8, 128>}]} {
    %c0 = arith.constant 0 : index
    %c0_0 = arith.constant 0 : index
    %0 = vector.load %arg1[%c0, %c0_0] : memref<8x16xbf16, #tpu.memory_space<vmem>>, vector<8x16xbf16>
    %c0_1 = arith.constant 0 : index
    %c0_2 = arith.constant 0 : index
    %1 = vector.load %arg2[%c0_1, %c0_2] : memref<16x32xbf16, #tpu.memory_space<vmem>>, vector<16x32xbf16>
    %cst = arith.constant dense<0.000000e+00> : vector<8x32xf32>
    %2 = tpu.matmul %0, %1, %cst {dimension_numbers = #tpu.dot_dimension_numbers<[1], [0], [0], [1], [0, 0, 1, 1], [], []>} : vector<8x16xbf16>, vector<16x32xbf16>, vector<8x32xf32> -> vector<8x32xf32>
    %c0_3 = arith.constant 0 : index
    %c0_4 = arith.constant 0 : index
    %3 = vector.load %arg3[%c0_3, %c0_4] : memref<1x32xf32, #tpu.memory_space<vmem>>, vector<1x32xf32>
    %4 = vector.broadcast %3 : vector<1x32xf32> to vector<8x32xf32>
    %5 = arith.addf %2, %4 : vector<8x32xf32>
    %c0_i32 = arith.constant 0 : i32
    %6 = arith.index_cast %c0_i32 : i32 to index
    %c0_5 = arith.constant 0 : index
    %c0_6 = arith.constant 0 : index
    %7 = vector.load %arg4[%6, %c0_5, %c0_6] : memref<2x32x32xbf16, #tpu.memory_space<vmem>>, vector<1x32x32xbf16>
    %8 = vector.shape_cast %7 : vector<1x32x32xbf16> to vector<32x32xbf16>
    %9 = arith.index_cast %c0_i32 : i32 to index
    %c0_7 = arith.constant 0 : index
    %c0_8 = arith.constant 0 : index
    %10 = vector.load %arg5[%9, %c0_7, %c0_8] : memref<2x32x32xbf16, #tpu.memory_space<vmem>>, vector<1x32x32xbf16>
    %11 = vector.shape_cast %10 : vector<1x32x32xbf16> to vector<32x32xbf16>
    %12 = arith.index_cast %c0_i32 : i32 to index
    %c0_9 = arith.constant 0 : index
    %c0_10 = arith.constant 0 : index
    %13 = vector.load %arg6[%12, %c0_9, %c0_10] : memref<2x4x32xf32, #tpu.memory_space<vmem>>, vector<1x4x32xf32>
    %14 = vector.shape_cast %13 : vector<1x4x32xf32> to vector<4x32xf32>
    %15 = vector.extract_strided_slice %14 {offsets = [0, 0], sizes = [1, 32], strides = [1, 1]} : vector<4x32xf32> to vector<1x32xf32>
    %16 = vector.extract_strided_slice %14 {offsets = [1, 0], sizes = [1, 32], strides = [1, 1]} : vector<4x32xf32> to vector<1x32xf32>
    %17 = vector.extract_strided_slice %14 {offsets = [2, 0], sizes = [1, 32], strides = [1, 1]} : vector<4x32xf32> to vector<1x32xf32>
    %18 = vector.extract_strided_slice %14 {offsets = [3, 0], sizes = [1, 32], strides = [1, 1]} : vector<4x32xf32> to vector<1x32xf32>
    %19 = arith.truncf %5 : vector<8x32xf32> to vector<8x32xbf16>
    %cst_11 = arith.constant dense<0.000000e+00> : vector<8x32xf32>
    %20 = tpu.matmul %19, %8, %cst_11 {dimension_numbers = #tpu.dot_dimension_numbers<[1], [0], [0], [1], [0, 0, 1, 1], [], []>} : vector<8x32xbf16>, vector<32x32xbf16>, vector<8x32xf32> -> vector<8x32xf32>
    %21 = vector.broadcast %15 : vector<1x32xf32> to vector<8x32xf32>
    %22 = arith.addf %20, %21 : vector<8x32xf32>
    %cst_12 = arith.constant 0.000000e+00 : f32
    %23 = vector.broadcast %cst_12 : f32 to vector<8x32xf32>
    %24 = arith.maximumf %22, %23 : vector<8x32xf32>
    %25 = arith.truncf %24 : vector<8x32xf32> to vector<8x32xbf16>
    %cst_13 = arith.constant dense<0.000000e+00> : vector<8x32xf32>
    %26 = tpu.matmul %25, %11, %cst_13 {dimension_numbers = #tpu.dot_dimension_numbers<[1], [0], [0], [1], [0, 0, 1, 1], [], []>} : vector<8x32xbf16>, vector<32x32xbf16>, vector<8x32xf32> -> vector<8x32xf32>
    %27 = vector.broadcast %16 : vector<1x32xf32> to vector<8x32xf32>
    %28 = arith.addf %26, %27 : vector<8x32xf32>
    %29 = arith.addf %28, %5 : vector<8x32xf32>
    %cst_14 = arith.constant dense<0.000000e+00> : vector<8xf32>
    %30 = vector.multi_reduction <add>, %29, %cst_14 [1] : vector<8x32xf32> to vector<8xf32>
    %31 = vector.shape_cast %30 : vector<8xf32> to vector<8x1xf32>
    %cst_15 = arith.constant 3.200000e+01 : f32
    %32 = vector.broadcast %cst_15 : f32 to vector<8x1xf32>
    %33 = arith.divf %31, %32 : vector<8x1xf32>
    %34 = vector.broadcast %33 : vector<8x1xf32> to vector<8x32xf32>
    %35 = arith.subf %29, %34 : vector<8x32xf32>
    %36 = arith.mulf %35, %35 : vector<8x32xf32>
    %cst_16 = arith.constant dense<0.000000e+00> : vector<8xf32>
    %37 = vector.multi_reduction <add>, %36, %cst_16 [1] : vector<8x32xf32> to vector<8xf32>
    %38 = vector.shape_cast %37 : vector<8xf32> to vector<8x1xf32>
    %cst_17 = arith.constant 3.200000e+01 : f32
    %39 = vector.broadcast %cst_17 : f32 to vector<8x1xf32>
    %40 = arith.divf %38, %39 : vector<8x1xf32>
    %41 = vector.broadcast %33 : vector<8x1xf32> to vector<8x32xf32>
    %42 = arith.subf %29, %41 : vector<8x32xf32>
    %cst_18 = arith.constant 9.99999974E-6 : f32
    %43 = vector.broadcast %cst_18 : f32 to vector<8x1xf32>
    %44 = arith.addf %40, %43 : vector<8x1xf32>
    %45 = math.rsqrt %44 : vector<8x1xf32>
    %46 = vector.broadcast %45 : vector<8x1xf32> to vector<8x32xf32>
    %47 = arith.mulf %42, %46 : vector<8x32xf32>
    %48 = vector.broadcast %17 : vector<1x32xf32> to vector<8x32xf32>
    %49 = arith.mulf %47, %48 : vector<8x32xf32>
    %50 = vector.broadcast %18 : vector<1x32xf32> to vector<8x32xf32>
    %51 = arith.addf %49, %50 : vector<8x32xf32>
    %cst_19 = arith.constant 0.000000e+00 : f32
    %52 = vector.broadcast %cst_19 : f32 to vector<8x32xf32>
    %53 = arith.maximumf %51, %52 : vector<8x32xf32>
    %c1_i32 = arith.constant 1 : i32
    %54 = arith.index_cast %c1_i32 : i32 to index
    %c0_20 = arith.constant 0 : index
    %c0_21 = arith.constant 0 : index
    %55 = vector.load %arg4[%54, %c0_20, %c0_21] : memref<2x32x32xbf16, #tpu.memory_space<vmem>>, vector<1x32x32xbf16>
    %56 = vector.shape_cast %55 : vector<1x32x32xbf16> to vector<32x32xbf16>
    %57 = arith.index_cast %c1_i32 : i32 to index
    %c0_22 = arith.constant 0 : index
    %c0_23 = arith.constant 0 : index
    %58 = vector.load %arg5[%57, %c0_22, %c0_23] : memref<2x32x32xbf16, #tpu.memory_space<vmem>>, vector<1x32x32xbf16>
    %59 = vector.shape_cast %58 : vector<1x32x32xbf16> to vector<32x32xbf16>
    %60 = arith.index_cast %c1_i32 : i32 to index
    %c0_24 = arith.constant 0 : index
    %c0_25 = arith.constant 0 : index
    %61 = vector.load %arg6[%60, %c0_24, %c0_25] : memref<2x4x32xf32, #tpu.memory_space<vmem>>, vector<1x4x32xf32>
    %62 = vector.shape_cast %61 : vector<1x4x32xf32> to vector<4x32xf32>
    %63 = vector.extract_strided_slice %62 {offsets = [0, 0], sizes = [1, 32], strides = [1, 1]} : vector<4x32xf32> to vector<1x32xf32>
    %64 = vector.extract_strided_slice %62 {offsets = [1, 0], sizes = [1, 32], strides = [1, 1]} : vector<4x32xf32> to vector<1x32xf32>
    %65 = vector.extract_strided_slice %62 {offsets = [2, 0], sizes = [1, 32], strides = [1, 1]} : vector<4x32xf32> to vector<1x32xf32>
    %66 = vector.extract_strided_slice %62 {offsets = [3, 0], sizes = [1, 32], strides = [1, 1]} : vector<4x32xf32> to vector<1x32xf32>
    %67 = arith.truncf %53 : vector<8x32xf32> to vector<8x32xbf16>
    %cst_26 = arith.constant dense<0.000000e+00> : vector<8x32xf32>
    %68 = tpu.matmul %67, %56, %cst_26 {dimension_numbers = #tpu.dot_dimension_numbers<[1], [0], [0], [1], [0, 0, 1, 1], [], []>} : vector<8x32xbf16>, vector<32x32xbf16>, vector<8x32xf32> -> vector<8x32xf32>
    %69 = vector.broadcast %63 : vector<1x32xf32> to vector<8x32xf32>
    %70 = arith.addf %68, %69 : vector<8x32xf32>
    %cst_27 = arith.constant 0.000000e+00 : f32
    %71 = vector.broadcast %cst_27 : f32 to vector<8x32xf32>
    %72 = arith.maximumf %70, %71 : vector<8x32xf32>
    %73 = arith.truncf %72 : vector<8x32xf32> to vector<8x32xbf16>
    %cst_28 = arith.constant dense<0.000000e+00> : vector<8x32xf32>
    %74 = tpu.matmul %73, %59, %cst_28 {dimension_numbers = #tpu.dot_dimension_numbers<[1], [0], [0], [1], [0, 0, 1, 1], [], []>} : vector<8x32xbf16>, vector<32x32xbf16>, vector<8x32xf32> -> vector<8x32xf32>
    %75 = vector.broadcast %64 : vector<1x32xf32> to vector<8x32xf32>
    %76 = arith.addf %74, %75 : vector<8x32xf32>
    %77 = arith.addf %76, %53 : vector<8x32xf32>
    %cst_29 = arith.constant dense<0.000000e+00> : vector<8xf32>
    %78 = vector.multi_reduction <add>, %77, %cst_29 [1] : vector<8x32xf32> to vector<8xf32>
    %79 = vector.shape_cast %78 : vector<8xf32> to vector<8x1xf32>
    %cst_30 = arith.constant 3.200000e+01 : f32
    %80 = vector.broadcast %cst_30 : f32 to vector<8x1xf32>
    %81 = arith.divf %79, %80 : vector<8x1xf32>
    %82 = vector.broadcast %81 : vector<8x1xf32> to vector<8x32xf32>
    %83 = arith.subf %77, %82 : vector<8x32xf32>
    %84 = arith.mulf %83, %83 : vector<8x32xf32>
    %cst_31 = arith.constant dense<0.000000e+00> : vector<8xf32>
    %85 = vector.multi_reduction <add>, %84, %cst_31 [1] : vector<8x32xf32> to vector<8xf32>
    %86 = vector.shape_cast %85 : vector<8xf32> to vector<8x1xf32>
    %cst_32 = arith.constant 3.200000e+01 : f32
    %87 = vector.broadcast %cst_32 : f32 to vector<8x1xf32>
    %88 = arith.divf %86, %87 : vector<8x1xf32>
    %89 = vector.broadcast %81 : vector<8x1xf32> to vector<8x32xf32>
    %90 = arith.subf %77, %89 : vector<8x32xf32>
    %cst_33 = arith.constant 9.99999974E-6 : f32
    %91 = vector.broadcast %cst_33 : f32 to vector<8x1xf32>
    %92 = arith.addf %88, %91 : vector<8x1xf32>
    %93 = math.rsqrt %92 : vector<8x1xf32>
    %94 = vector.broadcast %93 : vector<8x1xf32> to vector<8x32xf32>
    %95 = arith.mulf %90, %94 : vector<8x32xf32>
    %96 = vector.broadcast %65 : vector<1x32xf32> to vector<8x32xf32>
    %97 = arith.mulf %95, %96 : vector<8x32xf32>
    %98 = vector.broadcast %66 : vector<1x32xf32> to vector<8x32xf32>
    %99 = arith.addf %97, %98 : vector<8x32xf32>
    %cst_34 = arith.constant 0.000000e+00 : f32
    %100 = vector.broadcast %cst_34 : f32 to vector<8x32xf32>
    %101 = arith.maximumf %99, %100 : vector<8x32xf32>
    %c2_i32 = arith.constant 2 : i32
    %102 = arith.truncf %101 : vector<8x32xf32> to vector<8x32xbf16>
    %c0_35 = arith.constant 0 : index
    %c0_36 = arith.constant 0 : index
    %103 = vector.load %arg7[%c0_35, %c0_36] : memref<32x128xbf16, #tpu.memory_space<vmem>>, vector<32x128xbf16>
    %cst_37 = arith.constant dense<0.000000e+00> : vector<8x128xf32>
    %104 = tpu.matmul %102, %103, %cst_37 {dimension_numbers = #tpu.dot_dimension_numbers<[1], [0], [0], [1], [0, 0, 1, 1], [], []>} : vector<8x32xbf16>, vector<32x128xbf16>, vector<8x128xf32> -> vector<8x128xf32>
    %c0_38 = arith.constant 0 : index
    %c0_39 = arith.constant 0 : index
    %105 = vector.load %arg8[%c0_38, %c0_39] : memref<1x128xf32, #tpu.memory_space<vmem>>, vector<1x128xf32>
    %106 = vector.broadcast %105 : vector<1x128xf32> to vector<8x128xf32>
    %107 = arith.addf %104, %106 : vector<8x128xf32>
    %c0_40 = arith.constant 0 : index
    %c0_41 = arith.constant 0 : index
    %108 = vector.load %arg9[%c0_40, %c0_41] : memref<8x128xf32, #tpu.memory_space<vmem>>, vector<8x128xf32>
    tpu.vector_store %arg9[%c0_40, %c0_41], %107 {strides = array<i32>} : memref<8x128xf32, #tpu.memory_space<vmem>>, vector<8x128xf32>,
    return
  }
  func.func @transform_0(%arg0: i32) -> (i32, i32) {
    %c0_i32 = arith.constant 0 : i32
    %c0_i32_0 = arith.constant 0 : i32
    return %arg0, %c0_i32 : i32, i32
  }
  func.func @transform_1(%arg0: i32) -> (i32, i32) {
    %c0_i32 = arith.constant 0 : i32
    %c0_i32_0 = arith.constant 0 : i32
    %c0_i32_1 = arith.constant 0 : i32
    return %c0_i32, %c0_i32_0 : i32, i32
  }
  func.func @transform_2(%arg0: i32) -> (i32, i32) {
    %c0_i32 = arith.constant 0 : i32
    %c0_i32_0 = arith.constant 0 : i32
    %c0_i32_1 = arith.constant 0 : i32
    return %c0_i32, %c0_i32_0 : i32, i32
  }
  func.func @transform_3(%arg0: i32) -> (i32, i32, i32) {
    %c0_i32 = arith.constant 0 : i32
    %c0_i32_0 = arith.constant 0 : i32
    %c0_i32_1 = arith.constant 0 : i32
    %c0_i32_2 = arith.constant 0 : i32
    return %c0_i32, %c0_i32_0, %c0_i32_1 : i32, i32, i32
  }
  func.func @transform_4(%arg0: i32) -> (i32, i32, i32) {
    %c0_i32 = arith.constant 0 : i32
    %c0_i32_0 = arith.constant 0 : i32
    %c0_i32_1 = arith.constant 0 : i32
    %c0_i32_2 = arith.constant 0 : i32
    return %c0_i32, %c0_i32_0, %c0_i32_1 : i32, i32, i32
  }
  func.func @transform_5(%arg0: i32) -> (i32, i32, i32) {
    %c0_i32 = arith.constant 0 : i32
    %c0_i32_0 = arith.constant 0 : i32
    %c0_i32_1 = arith.constant 0 : i32
    %c0_i32_2 = arith.constant 0 : i32
    return %c0_i32, %c0_i32_0, %c0_i32_1 : i32, i32, i32
  }
  func.func @transform_6(%arg0: i32) -> (i32, i32) {
    %c0_i32 = arith.constant 0 : i32
    %c0_i32_0 = arith.constant 0 : i32
    %c0_i32_1 = arith.constant 0 : i32
    return %c0_i32, %c0_i32_0 : i32, i32
  }
  func.func @transform_7(%arg0: i32) -> (i32, i32) {
    %c0_i32 = arith.constant 0 : i32
    %c0_i32_0 = arith.constant 0 : i32
    %c0_i32_1 = arith.constant 0 : i32
    return %c0_i32, %c0_i32_0 : i32, i32
  }
  func.func @transform_8(%arg0: i32) -> (i32, i32) {
    %c0_i32 = arith.constant 0 : i32
    %c0_i32_0 = arith.constant 0 : i32
    return %arg0, %c0_i32 : i32, i32
  }
}

</mosaic_0001>

<bundles_post_ra>
// kernel: tpu_custom_call.1
= control target key start
LH: loop header
LB: loop body
LE: loop exit
PB: predicated region body
PF: predicated region fallthrough
CT: control target
= control target key end

     0   :  { %13 = vsyncpa [#allocation3], 0  ;;  %s928_s0 = inlined_call_operand.hbm [shape: bf16[8,16], index: 0, kind: input, shape index: {}]   ;;  %s929_s1 = inlined_call_operand.hbm [shape: bf16[16,32], index: 1, kind: input, shape index: {}]   ;;  %s930_s2 = inlined_call_operand.vmem [shape: f32[1,32], index: 2, kind: input, shape index: {}]   ;;  %s931_s3 = inlined_call_operand.hbm [shape: bf16[2,32,32], index: 3, kind: input, shape index: {}]   ;;  %s932_s4 = inlined_call_operand.hbm [shape: bf16[2,32,32], index: 4, kind: input, shape index: {}]   ;;  %s933_s5 = inlined_call_operand.vmem [shape: f32[2,4,32], index: 5, kind: input, shape index: {}]   ;;  %s934_s6 = inlined_call_operand.hbm [shape: bf16[32,128], index: 6, kind: input, shape index: {}]   ;;  %s935_s7 = inlined_call_operand.vmem [shape: f32[1,128], index: 7, kind: input, shape index: {}]   ;;  %s936_s8 = inlined_call_operand.hbm [shape: f32[8,128], index: 8, kind: output, shape index: {}]  }
   0x1   :  { %14 = vsyncpa [#allocation6], 0 }
   0x2   :  { %15 = vsyncpa [#allocation9], 0 }
   0x3   :  { %16 = vsyncpa [#allocation4], 0  ;;  %s793_s27 = smov [#allocation5]  }
   0x4   :  { %s32_s28 = sshll.u32 %s793_s27, 4  ;;  %s33_s28 = int_to_ptr.vmem [resolvable:$true] %s32_s28 }
   0x5   :  { %s673_s29 = scalar_lea.vmem %s33_s28, 128  ;;  %p678_p1 = scmp.lt.s32.totalorder %s33_s28, %s33_s28 }
   0x6   :  { %p674_p0 = scmp.ne.s32.totalorder %s33_s28, %s673_s29  ;;  %p679_p2 = scmp.lt.s32.totalorder %s673_s29, %s673_s29 }
   0x8   :  { %p680_p3 = por %p679_p2, %p678_p1 }
   0xa   :  { %p681_p4 = pnand %p680_p3, %p674_p0 }
   0xc   :  { %684 = shalt.err (!%p681_p4)
}
   0xd   :  { %s794_s30 = smov 64   ;;  %s795_s9 = smov 4  }
   0xe   :  { %38 = dma.hbm_to_vmem [thread:$0]  %s929_s1, 128, %s33_s28, [#allocation6], %s794_s30, %s794_s30, %s795_s9  }
   0xf   :  { %s796_s12 = smov [#allocation8]   ;;  %s797_s14 = smov [#allocation2]  }
  0x10   :  { %s58_s13 = sshll.u32 %s796_s12, 4  ;;  %s23_s15 = sshll.u32 %s797_s14, 4  ;;  %s59_s13 = int_to_ptr.vmem [resolvable:$true] %s58_s13  ;;  %s24_s15 = int_to_ptr.vmem [resolvable:$true] %s23_s15 }
  0x11   :  { %s693_s16 = scalar_lea.vmem %s59_s13, 512  ;;  %p698_p6 = scmp.lt.s32.totalorder %s59_s13, %s59_s13 }
  0x12   :  { %p694_p5 = scmp.ne.s32.totalorder %s59_s13, %s693_s16  ;;  %p699_p7 = scmp.lt.s32.totalorder %s693_s16, %s693_s16 }
  0x14   :  { %p700_p8 = por %p699_p7, %p698_p6 }
  0x16   :  { %p701_p9 = pnand %p700_p8, %p694_p5 }
  0x18   :  { %704 = shalt.err (!%p701_p9)
}
  0x19   :  { %64 = dma.hbm_to_vmem [thread:$0]  %s932_s4, 512, %s59_s13, [#allocation9], %s794_s30, %s794_s30, %s795_s9  }
  0x1a   :  { %s713_s1 = scalar_lea.vmem %s24_s15, 64  ;;  %p718_p11 = scmp.lt.s32.totalorder %s24_s15, %s24_s15 }
  0x1b   :  { %p714_p10 = scmp.ne.s32.totalorder %s24_s15, %s713_s1  ;;  %p719_p12 = scmp.lt.s32.totalorder %s713_s1, %s713_s1 }
  0x1d   :  { %p720_p13 = por %p719_p12, %p718_p11 }
  0x1f   :  { %p721_p0 = pnand %p720_p13, %p714_p10 }
  0x21   :  { %724 = shalt.err (!%p721_p0)
}
  0x22   :  { %26 = dma.hbm_to_vmem [thread:$0]  %s928_s0, 64, %s24_s15, [#allocation3]  }
  0x23   :  { %s798_s21 = smov [#allocation7]   ;;  %s799_s23 = smov [#allocation10]  }
  0x24   :  { %s46_s22 = sshll.u32 %s798_s21, 4  ;;  %s72_s24 = sshll.u32 %s799_s23, 4  ;;  %s47_s22 = int_to_ptr.vmem [resolvable:$true] %s46_s22  ;;  %s73_s24 = int_to_ptr.vmem [resolvable:$true] %s72_s24 }
  0x25   :  { %s733_s25 = scalar_lea.vmem %s47_s22, 512  ;;  %p738_p2 = scmp.lt.s32.totalorder %s47_s22, %s47_s22 }
  0x26   :  { %p734_p1 = scmp.ne.s32.totalorder %s47_s22, %s733_s25  ;;  %p739_p3 = scmp.lt.s32.totalorder %s733_s25, %s733_s25 }
  0x28   :  { %p740_p4 = por %p739_p3, %p738_p2 }
  0x2a   :  { %p741_p5 = pnand %p740_p4, %p734_p1 }
  0x2c   :  { %744 = shalt.err (!%p741_p5)
}
  0x2d   :  { %52 = dma.hbm_to_vmem [thread:$0]  %s931_s3, 512, %s47_s22, [#allocation6], %s794_s30, %s794_s30, %s795_s9  }
  0x2e   :  { %s753_s0 = scalar_lea.vmem %s73_s24, 256  ;;  %p758_p7 = scmp.lt.s32.totalorder %s73_s24, %s73_s24 }
  0x2f   :  { %p754_p6 = scmp.ne.s32.totalorder %s73_s24, %s753_s0  ;;  %p759_p8 = scmp.lt.s32.totalorder %s753_s0, %s753_s0 }
  0x31   :  { %p760_p9 = por %p759_p8, %p758_p7 }
  0x33   :  { %p761_p10 = pnand %p760_p9, %p754_p6 }
  0x35   :  { %764 = shalt.err (!%p761_p10)
}
  0x36   :  { %78 = dma.hbm_to_vmem [thread:$0]  %s934_s6, 256, %s73_s24, [#allocation9], %s794_s30, %s794_s30, %s795_s9  }
  0x37   :  { %785 = dma.done.wait [#allocation3], 64  }
  0x38   :  { %786 = vsyncadd [#allocation3], 4294967232 }
  0x39   :  { %787 = dma.done.wait [#allocation6], 640  }
  0x3a   :  { %788 = vsyncadd [#allocation6], 4294966656 }
  0x3b   :  { %789 = dma.done.wait [#allocation9], 768  }
  0x3c   :  { %790 = vsyncadd [#allocation9], 4294966528  ;;  %v800_v0 = vmov 0.0   ;;  %vm801_vm0 = vmmov 0   ;;  %v650_v1 = vld [vmem:[#allocation5] sm:$0xff]   ;;  %vm113_vm1 = vcmask 130048   ;;  %v167_v14 = vlaneseq }
  0x3d   :  { %594 = vmatprep.subr.bf16.mxu0 %v800_v0  ;;  %596 = vmatprep.mubr.msk.bf16.mxu0 %vm801_vm0, %v800_v0  ;;  %v97_v2 = vld [vmem:[#allocation2] sm:$0xf]  ;;  %v651_v3 = vld [vmem:[#allocation7 + $0x8] sm:$0xff]   ;;  %v652_v4 = vld [vmem:[#allocation7] sm:$0xff]   ;;  %vm183_vm2 = vcmask 261120   ;;  %s802_s11 = smov [#allocation11]  }
  0x3e   :  { %600 = vmatprep.subr.bf16.mxu1 %v800_v0  ;;  %604 = vmatprep.mubr.msk.bf16.mxu1 %vm801_vm0, %v800_v0  ;;  %v653_v5 = vld [vmem:[#allocation8 + $0x8] sm:$0xff]   ;;  %v654_v13 = vld [vmem:[#allocation8] sm:$0xff]   ;;  %v894_v15 = vshrl.u32 %v167_v14, 7  ;;  %v655_v40 = vld [vmem:[#allocation7 + $0x18] sm:$0xff]   ;;  %s546_s12 = sshll.u32 %s802_s11, 4  ;;  %s547_s12 = int_to_ptr.vmem [resolvable:$true] %s546_s12 }
  0x3f   :  { %595 = vmatpush3.bf16.msra.mxu0 %v650_v1  ;;  %601 = vmatpush3.bf16.msra.mxu1 %v651_v3  ;;  %v557_v6 = vld [vmem:[%s930_s2] ss:$0 sm:$0xff]  ;;  %v656_v41 = vld [vmem:[#allocation7 + $0x10] sm:$0xff]   ;;  %v657_v42 = vld [vmem:[#allocation8 + $0x18] sm:$0xff]   ;;  %s765_s13 = scalar_lea.vmem %s547_s12, 128  ;;  %p770_p12 = scmp.lt.s32.totalorder %s547_s12, %s547_s12 }
  0x40   :  { %608 = vmatprep.subr.bf16.mxu0 %v800_v0  ;;  %602 = vmatprep.subr.bf16.mxu1 %v800_v0  ;;  %v169_v16 = vsub.s32 0, %v894_v15  ;;  %v165_v17 = vld [vmem:[%s933_s5] sm:$0xf]  ;;  %v231_v26 = vsub.s32 1, %v894_v15  ;;  %v305_v46 = vsub.s32 2, %v894_v15  ;;  %v310_v47 = vsub.s32 3, %v894_v15  ;;  %p766_p11 = scmp.ne.s32.totalorder %s547_s12, %s765_s13  ;;  %p771_p13 = scmp.lt.s32.totalorder %s765_s13, %s765_s13 }
  0x41   :  { %v658_v56 = vld [vmem:[#allocation8 + $0x10] sm:$0xff]  }
  0x42   :  { %597 = vmatmul.mubr.msk.bf16.vlgmr.msra.gmra.mxu0 %vm113_vm1, %v97_v2  ;;  %v170_v18 = vrot.slane %v165_v17, %v169_v16  ;;  %v232_v27 = vrot.slane %v165_v17, %v231_v26  ;;  %v306_v48 = vrot.slane %v165_v17, %v305_v46  ;;  %v311_v50 = vrot.slane %v165_v17, %v310_v47  ;;  %v566_v57 = vld [vmem:[%s933_s5 + $0x4] sm:$0xf]  ;;  %v660_v17 = vld [vmem:[#allocation10] sm:$0xff]   ;;  %p772_p0 = por %p771_p13, %p770_p12 }
  0x43   :  { %612 = vmatprep.mubr.msk.bf16.mxu0 %vm801_vm0, %v800_v0  ;;  %603 = vmatpush3.bf16.msra.mxu1 %v652_v4  ;;  %v330_v58 = vrot.slane %v566_v57, %v169_v16  ;;  %v391_v3 = vrot.slane %v566_v57, %v231_v26  ;;  %v659_v16 = vld [vmem:[#allocation10 + $0x8] sm:$0xff]  }
  0x44   :  { %616 = vmatprep.subr.bf16.mxu1 %v800_v0  ;;  %609 = vmatpush3.bf16.msra.mxu0 %v653_v5  ;;  %p773_p1 = pnand %p772_p0, %p766_p11 }
  0x45   :  { %610 = vmatprep.subr.bf16.mxu0 %v800_v0 }
  0x48   :  { %611 = vmatpush3.bf16.msra.mxu0 %v654_v13 }
  0x49   :  { %624 = vmatprep.subr.bf16.mxu0 %v800_v0 }
 0x102   :  { %v151_v7 = vpop.f32.mrf.mxu0 }
 0x103   :  { %v152_v8 = vadd.f32 %v557_v6, %v151_v7 }
 0x104   :  { %v598_v9 = vpop.f32.mrf.mxu0 }
 0x105   :  { %v166_v10 = vpack.c.bf16 %v152_v8, %v152_v8 }
 0x106   :  { %v154_v11 = vpop.f32.mrf.mxu0 }
 0x107   :  { %605 = vmatmul.mubr.msk.bf16.vlgmr.msra.gmra.mxu1 %vm183_vm2, %v166_v10 }
 0x108   :  { %v599_v12 = vpop.f32.mrf.mxu0  ;;  %620 = vmatprep.mubr.msk.bf16.mxu1 %vm801_vm0, %v800_v0  ;;  %617 = vmatpush3.bf16.msra.mxu1 %v655_v40 }
 0x109   :  { %618 = vmatprep.subr.bf16.mxu1 %v800_v0 }
 0x10c   :  { %619 = vmatpush3.bf16.msra.mxu1 %v656_v41 }
 0x10d   :  { %632 = vmatprep.subr.bf16.mxu1 %v800_v0 }
 0x1c7   :  { %v221_v19 = vpop.f32.mrf.mxu1 }
 0x1c8   :  { %v222_v20 = vadd.f32 %v221_v19, %v170_v18 }
 0x1c9   :  { %v606_v21 = vpop.f32.mrf.mxu1 }
 0x1ca   :  { %v227_v22 = vmax.f32 %v222_v20, 0.0  ;;  %v464_v21 = vrot.slane %v566_v57, %v305_v46 }
 0x1cb   :  { %v224_v23 = vpop.f32.mrf.mxu1 }
 0x1cc   :  { %v228_v24 = vpack.c.bf16 %v227_v22, %v227_v22  ;;  %v469_v23 = vrot.slane %v566_v57, %v310_v47 }
 0x1cd   :  { %v607_v25 = vpop.f32.mrf.mxu1 }
 0x1ce   :  { %613 = vmatmul.mubr.msk.bf16.vlgmr.msra.gmra.mxu0 %vm183_vm2, %v228_v24 }
 0x1cf   :  { %628 = vmatprep.mubr.msk.bf16.mxu0 %vm801_vm0, %v800_v0  ;;  %625 = vmatpush3.bf16.msra.mxu0 %v657_v42 }
 0x1d0   :  { %626 = vmatprep.subr.bf16.mxu0 %v800_v0 }
 0x1d3   :  { %627 = vmatpush3.bf16.msra.mxu0 %v658_v56 }
 0x28e   :  { %v282_v28 = vpop.f32.mrf.mxu0 }
 0x28f   :  { %v283_v29 = vadd.f32 %v282_v28, %v232_v27 }
 0x290   :  { %v614_v30 = vpop.f32.mrf.mxu0 }
 0x291   :  { %v288_v31 = vadd.f32 %v283_v29, %v152_v8  ;;  %v573_v29 = vld [vmem:[%s935_s7] ss:$0 sm:$0xff] }
 0x292   :  { %v285_v32 = vpop.f32.mrf.mxu0 }
 0x293   :  { %v289_v33 = vsel %vm183_vm2, %v288_v31, 0.0 }
 0x294   :  { %290 = vadd.xlane.f32.xlu0 %v289_v33  ;;  %v615_v34 = vpop.f32.mrf.mxu0 }
 0x31d   :  { %v291_v35 = vpop.xlane.xlu0 %290 }
 0x31e   :  { %v293_v36 = vmul.f32 0.03125, %v291_v35 }
 0x320   :  { %v294_v37 = vsub.f32 %v288_v31, %v293_v36 }
 0x322   :  { %v295_v38 = vmul.f32 %v294_v37, %v294_v37 }
 0x324   :  { %v296_v39 = vsel %vm183_vm2, %v295_v38, 0.0 }
 0x325   :  { %297 = vadd.xlane.f32.xlu0 %v296_v39 }
 0x3ae   :  { %v298_v43 = vpop.xlane.xlu0 %297 }
 0x3af   :  { %v299_v44 = vmul.f32 0.03125, %v298_v43 }
 0x3b1   :  { %v300_v45 = vadd.f32 1e-05, %v299_v44 }
 0x3b3   :  { %661 = vrsqrt.f32 %v300_v45 }
 0x3c0   :  { %v662_v49 = vpop.eup %661 }
 0x3c1   :  { %v302_v51 = vmul.f32 %v662_v49, %v294_v37 }
 0x3c3   :  { %v307_v52 = vmul.f32 %v306_v48, %v302_v51 }
 0x3c5   :  { %v312_v53 = vadd.f32 %v311_v50, %v307_v52 }
 0x3c7   :  { %v313_v54 = vmax.f32 %v312_v53, 0.0 }
 0x3c9   :  { %v326_v55 = vpack.c.bf16 %v313_v54, %v313_v54 }
 0x3cb   :  { %621 = vmatmul.mubr.msk.bf16.vlgmr.msra.gmra.mxu1 %vm183_vm2, %v326_v55 }
 0x3cc   :  { %636 = vmatprep.mubr.msk.bf16.mxu1 %vm801_vm0, %v800_v0  ;;  %633 = vmatpush3.bf16.msra.mxu1 %v659_v16 }
 0x3cd   :  { %634 = vmatprep.subr.bf16.mxu1 %v800_v0 }
 0x3d0   :  { %635 = vmatpush3.bf16.msra.mxu1 %v660_v17 }
 0x48b   :  { %v380_v59 = vpop.f32.mrf.mxu1 }
 0x48c   :  { %v381_v60 = vadd.f32 %v380_v59, %v330_v58 }
 0x48d   :  { %v622_v61 = vpop.f32.mrf.mxu1 }
 0x48e   :  { %v386_v62 = vmax.f32 %v381_v60, 0.0 }
 0x48f   :  { %v383_v63 = vpop.f32.mrf.mxu1 }
 0x490   :  { %v387_v1 = vpack.c.bf16 %v386_v62, %v386_v62 }
 0x491   :  { %v623_v2 = vpop.f32.mrf.mxu1 }
 0x492   :  { %629 = vmatmul.mubr.msk.bf16.vlgmr.msra.gmra.mxu0 %vm183_vm2, %v387_v1 }
 0x552   :  { %v441_v4 = vpop.f32.mrf.mxu0 }
 0x553   :  { %v442_v5 = vadd.f32 %v441_v4, %v391_v3 }
 0x554   :  { %v630_v6 = vpop.f32.mrf.mxu0 }
 0x555   :  { %v447_v7 = vadd.f32 %v442_v5, %v313_v54 }
 0x556   :  { %v444_v8 = vpop.f32.mrf.mxu0 }
 0x557   :  { %v448_v9 = vsel %vm183_vm2, %v447_v7, 0.0 }
 0x558   :  { %449 = vadd.xlane.f32.xlu1 %v448_v9  ;;  %v631_v10 = vpop.f32.mrf.mxu0 }
 0x5e1   :  { %v450_v11 = vpop.xlane.xlu1 %449 }
 0x5e2   :  { %v451_v12 = vmul.f32 0.03125, %v450_v11 }
 0x5e4   :  { %v452_v13 = vsub.f32 %v447_v7, %v451_v12 }
 0x5e6   :  { %v453_v14 = vmul.f32 %v452_v13, %v452_v13 }
 0x5e8   :  { %v454_v15 = vsel %vm183_vm2, %v453_v14, 0.0 }
 0x5e9   :  { %455 = vadd.xlane.f32.xlu1 %v454_v15 }
 0x672   :  { %v456_v18 = vpop.xlane.xlu1 %455 }
 0x673   :  { %v457_v19 = vmul.f32 0.03125, %v456_v18 }
 0x675   :  { %v458_v20 = vadd.f32 1e-05, %v457_v19 }
 0x677   :  { %663 = vrsqrt.f32 %v458_v20 }
 0x684   :  { %v664_v22 = vpop.eup %663 }
 0x685   :  { %v460_v24 = vmul.f32 %v664_v22, %v452_v13 }
 0x687   :  { %v465_v25 = vmul.f32 %v464_v21, %v460_v24 }
 0x689   :  { %v470_v26 = vadd.f32 %v469_v23, %v465_v25 }
 0x68b   :  { %v471_v27 = vmax.f32 %v470_v26, 0.0 }
 0x68d   :  { %v472_v28 = vpack.c.bf16 %v471_v27, %v471_v27 }
 0x68f   :  { %637 = vmatmul.mubr.msk.bf16.vlgmr.msra.gmra.mxu1 %vm183_vm2, %v472_v28 }
 0x74f   :  { %v533_v0 = vpop.f32.mrf.mxu1 }
 0x750   :  { %v534_v30 = vadd.f32 %v573_v29, %v533_v0 }
 0x751   :  { %v638_v31 = vpop.f32.mrf.mxu1 }
 0x752   :  { %539 = vst [vmem:[#allocation11] sm:$0xff] %v534_v30 }
 0x753   :  { %v536_v32 = vpop.f32.mrf.mxu1 }
 0x754   :  { %776 = shalt.err (!%p773_p1)
}
 0x755   :  { %549 = dma.vmem_to_hbm [thread:$0]  %s547_s12, 128, %s936_s8, [#allocation4]   ;;  %v639_v33 = vpop.f32.mrf.mxu1 }
 0x756   :  { %791 = dma.done.wait [#allocation4], 128  }
 0x757   :  { %792 = vsyncadd [#allocation4], 4294967168 }
 0x758   :  { %553 = vsyncpa [#allocation3], 1 }
 0x759   :  { %554 = vsyncpa [#allocation6], 1 }
 0x75a   :  { %555 = vsyncpa [#allocation9], 1 }
 0x75b   :  { %556 = vsyncpa [#allocation4], 1 }

// kernel: tpu_custom_call.1
= control target key start
LH: loop header
LB: loop body
LE: loop exit
PB: predicated region body
PF: predicated region fallthrough
CT: control target
= control target key end

     0   :  { %13 = vsyncpa [#allocation3], 0  ;;  %s928_s0 = inlined_call_operand.hbm [shape: bf16[8,16], index: 0, kind: input, shape index: {}]   ;;  %s929_s1 = inlined_call_operand.hbm [shape: bf16[16,32], index: 1, kind: input, shape index: {}]   ;;  %s930_s2 = inlined_call_operand.vmem [shape: f32[1,32], index: 2, kind: input, shape index: {}]   ;;  %s931_s3 = inlined_call_operand.hbm [shape: bf16[2,32,32], index: 3, kind: input, shape index: {}]   ;;  %s932_s4 = inlined_call_operand.hbm [shape: bf16[2,32,32], index: 4, kind: input, shape index: {}]   ;;  %s933_s5 = inlined_call_operand.vmem [shape: f32[2,4,32], index: 5, kind: input, shape index: {}]   ;;  %s934_s6 = inlined_call_operand.hbm [shape: bf16[32,128], index: 6, kind: input, shape index: {}]   ;;  %s935_s7 = inlined_call_operand.vmem [shape: f32[1,128], index: 7, kind: input, shape index: {}]   ;;  %s936_s8 = inlined_call_operand.hbm [shape: f32[8,128], index: 8, kind: output, shape index: {}]  }
   0x1   :  { %14 = vsyncpa [#allocation6], 0 }
   0x2   :  { %15 = vsyncpa [#allocation9], 0 }
   0x3   :  { %16 = vsyncpa [#allocation4], 0  ;;  %s793_s27 = smov [#allocation5]  }
   0x4   :  { %s32_s28 = sshll.u32 %s793_s27, 4  ;;  %s33_s28 = int_to_ptr.vmem [resolvable:$true] %s32_s28 }
   0x5   :  { %s673_s29 = scalar_lea.vmem %s33_s28, 128  ;;  %p678_p1 = scmp.lt.s32.totalorder %s33_s28, %s33_s28 }
   0x6   :  { %p674_p0 = scmp.ne.s32.totalorder %s33_s28, %s673_s29  ;;  %p679_p2 = scmp.lt.s32.totalorder %s673_s29, %s673_s29 }
   0x8   :  { %p680_p3 = por %p679_p2, %p678_p1 }
   0xa   :  { %p681_p4 = pnand %p680_p3, %p674_p0 }
   0xc   :  { %684 = shalt.err (!%p681_p4)
}
   0xd   :  { %s794_s30 = smov 64   ;;  %s795_s9 = smov 4  }
   0xe   :  { %38 = dma.hbm_to_vmem [thread:$0]  %s929_s1, 128, %s33_s28, [#allocation6], %s794_s30, %s794_s30, %s795_s9  }
   0xf   :  { %s796_s12 = smov [#allocation8]   ;;  %s797_s14 = smov [#allocation2]  }
  0x10   :  { %s58_s13 = sshll.u32 %s796_s12, 4  ;;  %s23_s15 = sshll.u32 %s797_s14, 4  ;;  %s59_s13 = int_to_ptr.vmem [resolvable:$true] %s58_s13  ;;  %s24_s15 = int_to_ptr.vmem [resolvable:$true] %s23_s15 }
  0x11   :  { %s693_s16 = scalar_lea.vmem %s59_s13, 512  ;;  %p698_p6 = scmp.lt.s32.totalorder %s59_s13, %s59_s13 }
  0x12   :  { %p694_p5 = scmp.ne.s32.totalorder %s59_s13, %s693_s16  ;;  %p699_p7 = scmp.lt.s32.totalorder %s693_s16, %s693_s16 }
  0x14   :  { %p700_p8 = por %p699_p7, %p698_p6 }
  0x16   :  { %p701_p9 = pnand %p700_p8, %p694_p5 }
  0x18   :  { %704 = shalt.err (!%p701_p9)
}
  0x19   :  { %64 = dma.hbm_to_vmem [thread:$0]  %s932_s4, 512, %s59_s13, [#allocation9], %s794_s30, %s794_s30, %s795_s9  }
  0x1a   :  { %s713_s1 = scalar_lea.vmem %s24_s15, 64  ;;  %p718_p11 = scmp.lt.s32.totalorder %s24_s15, %s24_s15 }
  0x1b   :  { %p714_p10 = scmp.ne.s32.totalorder %s24_s15, %s713_s1  ;;  %p719_p12 = scmp.lt.s32.totalorder %s713_s1, %s713_s1 }
  0x1d   :  { %p720_p13 = por %p719_p12, %p718_p11 }
  0x1f   :  { %p721_p0 = pnand %p720_p13, %p714_p10 }
  0x21   :  { %724 = shalt.err (!%p721_p0)
}
  0x22   :  { %26 = dma.hbm_to_vmem [thread:$0]  %s928_s0, 64, %s24_s15, [#allocation3]  }
  0x23   :  { %s798_s21 = smov [#allocation7]   ;;  %s799_s23 = smov [#allocation10]  }
  0x24   :  { %s46_s22 = sshll.u32 %s798_s21, 4  ;;  %s72_s24 = sshll.u32 %s799_s23, 4  ;;  %s47_s22 = int_to_ptr.vmem [resolvable:$true] %s46_s22  ;;  %s73_s24 = int_to_ptr.vmem [resolvable:$true] %s72_s24 }
  0x25   :  { %s733_s25 = scalar_lea.vmem %s47_s22, 512  ;;  %p738_p2 = scmp.lt.s32.totalorder %s47_s22, %s47_s22 }
  0x26   :  { %p734_p1 = scmp.ne.s32.totalorder %s47_s22, %s733_s25  ;;  %p739_p3 = scmp.lt.s32.totalorder %s733_s25, %s733_s25 }
  0x28   :  { %p740_p4 = por %p739_p3, %p738_p2 }
  0x2a   :  { %p741_p5 = pnand %p740_p4, %p734_p1 }
  0x2c   :  { %744 = shalt.err (!%p741_p5)
}
  0x2d   :  { %52 = dma.hbm_to_vmem [thread:$0]  %s931_s3, 512, %s47_s22, [#allocation6], %s794_s30, %s794_s30, %s795_s9  }
  0x2e   :  { %s753_s0 = scalar_lea.vmem %s73_s24, 256  ;;  %p758_p7 = scmp.lt.s32.totalorder %s73_s24, %s73_s24 }
  0x2f   :  { %p754_p6 = scmp.ne.s32.totalorder %s73_s24, %s753_s0  ;;  %p759_p8 = scmp.lt.s32.totalorder %s753_s0, %s753_s0 }
  0x31   :  { %p760_p9 = por %p759_p8, %p758_p7 }
  0x33   :  { %p761_p10 = pnand %p760_p9, %p754_p6 }
  0x35   :  { %764 = shalt.err (!%p761_p10)
}
  0x36   :  { %78 = dma.hbm_to_vmem [thread:$0]  %s934_s6, 256, %s73_s24, [#allocation9], %s794_s30, %s794_s30, %s795_s9  }
  0x37   :  { %785 = dma.done.wait [#allocation3], 64  }
  0x38   :  { %786 = vsyncadd [#allocation3], 4294967232 }
  0x39   :  { %787 = dma.done.wait [#allocation6], 640  }
  0x3a   :  { %788 = vsyncadd [#allocation6], 4294966656 }
  0x3b   :  { %789 = dma.done.wait [#allocation9], 768  }
  0x3c   :  { %790 = vsyncadd [#allocation9], 4294966528  ;;  %v800_v0 = vmov 0.0   ;;  %vm801_vm0 = vmmov 0   ;;  %v650_v1 = vld [vmem:[#allocation5] sm:$0xff]   ;;  %vm113_vm1 = vcmask 130048   ;;  %v167_v14 = vlaneseq }
  0x3d   :  { %594 = vmatprep.subr.bf16.mxu0 %v800_v0  ;;  %596 = vmatprep.mubr.msk.bf16.mxu0 %vm801_vm0, %v800_v0  ;;  %v97_v2 = vld [vmem:[#allocation2] sm:$0xf]  ;;  %v651_v3 = vld [vmem:[#allocation7 + $0x8] sm:$0xff]   ;;  %v652_v4 = vld [vmem:[#allocation7] sm:$0xff]   ;;  %vm183_vm2 = vcmask 261120   ;;  %s802_s11 = smov [#allocation11]  }
  0x3e   :  { %600 = vmatprep.subr.bf16.mxu1 %v800_v0  ;;  %604 = vmatprep.mubr.msk.bf16.mxu1 %vm801_vm0, %v800_v0  ;;  %v653_v5 = vld [vmem:[#allocation8 + $0x8] sm:$0xff]   ;;  %v654_v13 = vld [vmem:[#allocation8] sm:$0xff]   ;;  %v894_v15 = vshrl.u32 %v167_v14, 7  ;;  %v655_v40 = vld [vmem:[#allocation7 + $0x18] sm:$0xff]   ;;  %s546_s12 = sshll.u32 %s802_s11, 4  ;;  %s547_s12 = int_to_ptr.vmem [resolvable:$true] %s546_s12 }
  0x3f   :  { %595 = vmatpush3.bf16.msra.mxu0 %v650_v1  ;;  %601 = vmatpush3.bf16.msra.mxu1 %v651_v3  ;;  %v557_v6 = vld [vmem:[%s930_s2] ss:$0 sm:$0xff]  ;;  %v656_v41 = vld [vmem:[#allocation7 + $0x10] sm:$0xff]   ;;  %v657_v42 = vld [vmem:[#allocation8 + $0x18] sm:$0xff]   ;;  %s765_s13 = scalar_lea.vmem %s547_s12, 128  ;;  %p770_p12 = scmp.lt.s32.totalorder %s547_s12, %s547_s12 }
  0x40   :  { %608 = vmatprep.subr.bf16.mxu0 %v800_v0  ;;  %602 = vmatprep.subr.bf16.mxu1 %v800_v0  ;;  %v169_v16 = vsub.s32 0, %v894_v15  ;;  %v165_v17 = vld [vmem:[%s933_s5] sm:$0xf]  ;;  %v231_v26 = vsub.s32 1, %v894_v15  ;;  %v305_v46 = vsub.s32 2, %v894_v15  ;;  %v310_v47 = vsub.s32 3, %v894_v15  ;;  %p766_p11 = scmp.ne.s32.totalorder %s547_s12, %s765_s13  ;;  %p771_p13 = scmp.lt.s32.totalorder %s765_s13, %s765_s13 }
  0x41   :  { %v658_v56 = vld [vmem:[#allocation8 + $0x10] sm:$0xff]  }
  0x42   :  { %597 = vmatmul.mubr.msk.bf16.vlgmr.msra.gmra.mxu0 %vm113_vm1, %v97_v2  ;;  %v170_v18 = vrot.slane %v165_v17, %v169_v16  ;;  %v232_v27 = vrot.slane %v165_v17, %v231_v26  ;;  %v306_v48 = vrot.slane %v165_v17, %v305_v46  ;;  %v311_v50 = vrot.slane %v165_v17, %v310_v47  ;;  %v566_v57 = vld [vmem:[%s933_s5 + $0x4] sm:$0xf]  ;;  %v660_v17 = vld [vmem:[#allocation10] sm:$0xff]   ;;  %p772_p0 = por %p771_p13, %p770_p12 }
  0x43   :  { %612 = vmatprep.mubr.msk.bf16.mxu0 %vm801_vm0, %v800_v0  ;;  %603 = vmatpush3.bf16.msra.mxu1 %v652_v4  ;;  %v330_v58 = vrot.slane %v566_v57, %v169_v16  ;;  %v391_v3 = vrot.slane %v566_v57, %v231_v26  ;;  %v659_v16 = vld [vmem:[#allocation10 + $0x8] sm:$0xff]  }
  0x44   :  { %616 = vmatprep.subr.bf16.mxu1 %v800_v0  ;;  %609 = vmatpush3.bf16.msra.mxu0 %v653_v5  ;;  %p773_p1 = pnand %p772_p0, %p766_p11 }
  0x45   :  { %610 = vmatprep.subr.bf16.mxu0 %v800_v0 }
  0x48   :  { %611 = vmatpush3.bf16.msra.mxu0 %v654_v13 }
  0x49   :  { %624 = vmatprep.subr.bf16.mxu0 %v800_v0 }
 0x102   :  { %v151_v7 = vpop.f32.mrf.mxu0 }
 0x103   :  { %v152_v8 = vadd.f32 %v557_v6, %v151_v7 }
 0x104   :  { %v598_v9 = vpop.f32.mrf.mxu0 }
 0x105   :  { %v166_v10 = vpack.c.bf16 %v152_v8, %v152_v8 }
 0x106   :  { %v154_v11 = vpop.f32.mrf.mxu0 }
 0x107   :  { %605 = vmatmul.mubr.msk.bf16.vlgmr.msra.gmra.mxu1 %vm183_vm2, %v166_v10 }
 0x108   :  { %v599_v12 = vpop.f32.mrf.mxu0  ;;  %620 = vmatprep.mubr.msk.bf16.mxu1 %vm801_vm0, %v800_v0  ;;  %617 = vmatpush3.bf16.msra.mxu1 %v655_v40 }
 0x109   :  { %618 = vmatprep.subr.bf16.mxu1 %v800_v0 }
 0x10c   :  { %619 = vmatpush3.bf16.msra.mxu1 %v656_v41 }
 0x10d   :  { %632 = vmatprep.subr.bf16.mxu1 %v800_v0 }
 0x1c7   :  { %v221_v19 = vpop.f32.mrf.mxu1 }
 0x1c8   :  { %v222_v20 = vadd.f32 %v221_v19, %v170_v18 }
 0x1c9   :  { %v606_v21 = vpop.f32.mrf.mxu1 }
 0x1ca   :  { %v227_v22 = vmax.f32 %v222_v20, 0.0  ;;  %v464_v21 = vrot.slane %v566_v57, %v305_v46 }
 0x1cb   :  { %v224_v23 = vpop.f32.mrf.mxu1 }
 0x1cc   :  { %v228_v24 = vpack.c.bf16 %v227_v22, %v227_v22  ;;  %v469_v23 = vrot.slane %v566_v57, %v310_v47 }
 0x1cd   :  { %v607_v25 = vpop.f32.mrf.mxu1 }
 0x1ce   :  { %613 = vmatmul.mubr.msk.bf16.vlgmr.msra.gmra.mxu0 %vm183_vm2, %v228_v24 }
 0x1cf   :  { %628 = vmatprep.mubr.msk.bf16.mxu0 %vm801_vm0, %v800_v0  ;;  %625 = vmatpush3.bf16.msra.mxu0 %v657_v42 }
 0x1d0   :  { %626 = vmatprep.subr.bf16.mxu0 %v800_v0 }
 0x1d3   :  { %627 = vmatpush3.bf16.msra.mxu0 %v658_v56 }
 0x28e   :  { %v282_v28 = vpop.f32.mrf.mxu0 }
 0x28f   :  { %v283_v29 = vadd.f32 %v282_v28, %v232_v27 }
 0x290   :  { %v614_v30 = vpop.f32.mrf.mxu0 }
 0x291   :  { %v288_v31 = vadd.f32 %v283_v29, %v152_v8  ;;  %v573_v29 = vld [vmem:[%s935_s7] ss:$0 sm:$0xff] }
 0x292   :  { %v285_v32 = vpop.f32.mrf.mxu0 }
 0x293   :  { %v289_v33 = vsel %vm183_vm2, %v288_v31, 0.0 }
 0x294   :  { %290 = vadd.xlane.f32.xlu0 %v289_v33  ;;  %v615_v34 = vpop.f32.mrf.mxu0 }
 0x31d   :  { %v291_v35 = vpop.xlane.xlu0 %290 }
 0x31e   :  { %v293_v36 = vmul.f32 0.03125, %v291_v35 }
 0x320   :  { %v294_v37 = vsub.f32 %v288_v31, %v293_v36 }
 0x322   :  { %v295_v38 = vmul.f32 %v294_v37, %v294_v37 }
 0x324   :  { %v296_v39 = vsel %vm183_vm2, %v295_v38, 0.0 }
 0x325   :  { %297 = vadd.xlane.f32.xlu0 %v296_v39 }
 0x3ae   :  { %v298_v43 = vpop.xlane.xlu0 %297 }
 0x3af   :  { %v299_v44 = vmul.f32 0.03125, %v298_v43 }
 0x3b1   :  { %v300_v45 = vadd.f32 1e-05, %v299_v44 }
 0x3b3   :  { %661 = vrsqrt.f32 %v300_v45 }
 0x3c0   :  { %v662_v49 = vpop.eup %661 }
 0x3c1   :  { %v302_v51 = vmul.f32 %v662_v49, %v294_v37 }
 0x3c3   :  { %v307_v52 = vmul.f32 %v306_v48, %v302_v51 }
 0x3c5   :  { %v312_v53 = vadd.f32 %v311_v50, %v307_v52 }
 0x3c7   :  { %v313_v54 = vmax.f32 %v312_v53, 0.0 }
 0x3c9   :  { %v326_v55 = vpack.c.bf16 %v313_v54, %v313_v54 }
 0x3cb   :  { %621 = vmatmul.mubr.msk.bf16.vlgmr.msra.gmra.mxu1 %vm183_vm2, %v326_v55 }
 0x3cc   :  { %636 = vmatprep.mubr.msk.bf16.mxu1 %vm801_vm0, %v800_v0  ;;  %633 = vmatpush3.bf16.msra.mxu1 %v659_v16 }
 0x3cd   :  { %634 = vmatprep.subr.bf16.mxu1 %v800_v0 }
 0x3d0   :  { %635 = vmatpush3.bf16.msra.mxu1 %v660_v17 }
 0x48b   :  { %v380_v59 = vpop.f32.mrf.mxu1 }
 0x48c   :  { %v381_v60 = vadd.f32 %v380_v59, %v330_v58 }
 0x48d   :  { %v622_v61 = vpop.f32.mrf.mxu1 }
 0x48e   :  { %v386_v62 = vmax.f32 %v381_v60, 0.0 }
 0x48f   :  { %v383_v63 = vpop.f32.mrf.mxu1 }
 0x490   :  { %v387_v1 = vpack.c.bf16 %v386_v62, %v386_v62 }
 0x491   :  { %v623_v2 = vpop.f32.mrf.mxu1 }
 0x492   :  { %629 = vmatmul.mubr.msk.bf16.vlgmr.msra.gmra.mxu0 %vm183_vm2, %v387_v1 }
 0x552   :  { %v441_v4 = vpop.f32.mrf.mxu0 }
 0x553   :  { %v442_v5 = vadd.f32 %v441_v4, %v391_v3 }
 0x554   :  { %v630_v6 = vpop.f32.mrf.mxu0 }
 0x555   :  { %v447_v7 = vadd.f32 %v442_v5, %v313_v54 }
 0x556   :  { %v444_v8 = vpop.f32.mrf.mxu0 }
 0x557   :  { %v448_v9 = vsel %vm183_vm2, %v447_v7, 0.0 }
 0x558   :  { %449 = vadd.xlane.f32.xlu1 %v448_v9  ;;  %v631_v10 = vpop.f32.mrf.mxu0 }
 0x5e1   :  { %v450_v11 = vpop.xlane.xlu1 %449 }
 0x5e2   :  { %v451_v12 = vmul.f32 0.03125, %v450_v11 }
 0x5e4   :  { %v452_v13 = vsub.f32 %v447_v7, %v451_v12 }
 0x5e6   :  { %v453_v14 = vmul.f32 %v452_v13, %v452_v13 }
 0x5e8   :  { %v454_v15 = vsel %vm183_vm2, %v453_v14, 0.0 }
 0x5e9   :  { %455 = vadd.xlane.f32.xlu1 %v454_v15 }
 0x672   :  { %v456_v18 = vpop.xlane.xlu1 %455 }
 0x673   :  { %v457_v19 = vmul.f32 0.03125, %v456_v18 }
 0x675   :  { %v458_v20 = vadd.f32 1e-05, %v457_v19 }
 0x677   :  { %663 = vrsqrt.f32 %v458_v20 }
 0x684   :  { %v664_v22 = vpop.eup %663 }
 0x685   :  { %v460_v24 = vmul.f32 %v664_v22, %v452_v13 }
 0x687   :  { %v465_v25 = vmul.f32 %v464_v21, %v460_v24 }
 0x689   :  { %v470_v26 = vadd.f32 %v469_v23, %v465_v25 }
 0x68b   :  { %v471_v27 = vmax.f32 %v470_v26, 0.0 }
 0x68d   :  { %v472_v28 = vpack.c.bf16 %v471_v27, %v471_v27 }
 0x68f   :  { %637 = vmatmul.mubr.msk.bf16.vlgmr.msra.gmra.mxu1 %vm183_vm2, %v472_v28 }
 0x74f   :  { %v533_v0 = vpop.f32.mrf.mxu1 }
 0x750   :  { %v534_v30 = vadd.f32 %v573_v29, %v533_v0 }
 0x751   :  { %v638_v31 = vpop.f32.mrf.mxu1 }
 0x752   :  { %539 = vst [vmem:[#allocation11] sm:$0xff] %v534_v30 }
 0x753   :  { %v536_v32 = vpop.f32.mrf.mxu1 }
 0x754   :  { %776 = shalt.err (!%p773_p1)
}
 0x755   :  { %549 = dma.vmem_to_hbm [thread:$0]  %s547_s12, 128, %s936_s8, [#allocation4]   ;;  %v639_v33 = vpop.f32.mrf.mxu1 }
 0x756   :  { %791 = dma.done.wait [#allocation4], 128  }
 0x757   :  { %792 = vsyncadd [#allocation4], 4294967168 }
 0x758   :  { %553 = vsyncpa [#allocation3], 1 }
 0x759   :  { %554 = vsyncpa [#allocation6], 1 }
 0x75a   :  { %555 = vsyncpa [#allocation9], 1 }
 0x75b   :  { %556 = vsyncpa [#allocation4], 1 }

</bundles_post_ra>
